<compile_context>
chip_gen: v6e
topology: v6e:2x2x1
jax: 0.10.0
libtpu: 0.0.40
codegen_flags: <defaults>
</compile_context>

<pallas_src>
import math

import jax
import jax.numpy as jnp
from jax.experimental import pallas as pl
from jax.experimental.pallas import tpu as pltpu


_IN = 64
_OUT = 2
_MAX_FOLD = 64          # fold*_OUT = 128 lanes -> fully lane-dense output block


def _round_up(n: int, m: int) -> int:
    return ((n + m - 1) // m) * m


def _pick_fold(batch: int) -> int:
    for f in (64, 32, 16, 8, 4, 2):
        if batch % f == 0:
            return f
    return 1


def fuse_params(params):
    """Collapse fc1/fc2/fc3 (stored [in, out]) into one affine map (W_f [64,2], b_f [1,2])."""
    w1, b1, w2, b2, w3, b3 = params
    hp = jax.lax.Precision.HIGHEST
    w_f = jnp.dot(jnp.dot(w1, w2, precision=hp), w3, precision=hp)
    b_f = jnp.dot(jnp.dot(b1, w2, precision=hp) + b2, w3, precision=hp) + b3
    return w_f, b_f


def _expand_block_diag(w_f, b_f, fold):
    """Block-diagonal expansion so `fold` batch rows are processed as one lane-dense row."""
    if fold == 1:
        return w_f, b_f
    eye = jnp.eye(fold, dtype=w_f.dtype)
    # w_big[f*64 + k, g*2 + j] = (f == g) * w_f[k, j]
    w_big = jnp.einsum("fg,kj->fkgj", eye, w_f).reshape(fold * _IN, fold * _OUT)
    b_big = jnp.tile(b_f, (1, fold))                      # [1, fold*2], b_big[0, g*2+j] = b_f[0, j]
    return w_big, b_big


def _fused_affine_kernel(x_ref, w_ref, b_ref, o_ref):
    # x_ref: [t_tile, fold*64] (streamed)      w_ref: [fold*64, fold*2] (VMEM-resident)
    # b_ref: [1, fold*2] f32 (VMEM-resident)   o_ref: [t_tile, fold*2] f32
    acc = jnp.dot(x_ref[...], w_ref[...], preferred_element_type=jnp.float32)
    o_ref[...] = (acc + b_ref[...]).astype(o_ref.dtype)


def linear_net_forward(sim, params, *, tile_rows_max=8192):
    """sim: [B, 64, 1] (PyTorch-style) or [B, 64]. Returns [B, 2] float32."""
    B = sim.shape[0]
    x = sim.reshape(B, _IN)                    # squeeze(-1); free row-major reshape

    # Stream in the caller's dtype: no extra HBM cast pass (bf16 kept as bf16).
    compute_dtype = jnp.bfloat16 if x.dtype == jnp.bfloat16 else jnp.float32
    if x.dtype != compute_dtype:
        x = x.astype(compute_dtype)            # only hit for unusual input dtypes

    w_f, b_f = fuse_params(params)
    fold = _pick_fold(B)
    w_big, b_big = _expand_block_diag(w_f, b_f, fold)
    w_big = w_big.astype(compute_dtype)        # <=2 MiB; matmul still accumulates in f32
    b_big = b_big.astype(jnp.float32)          # bias add stays f32

    T = B // fold                              # folded rows
    xf = x.reshape(T, fold * _IN)              # free reshape (row-major contiguous)

    sub = 16 if compute_dtype == jnp.bfloat16 else 8
    max_t = max(1, tile_rows_max // fold)
    t_tile = _round_up(min(max_t, T), sub)

    grid = (pl.cdiv(T, t_tile),)               # ragged last block masked by Pallas: no pad

    out = pl.pallas_call(
        _fused_affine_kernel,
        out_shape=jax.ShapeDtypeStruct((T, fold * _OUT), jnp.float32),
        grid=grid,
        in_specs=[
            pl.BlockSpec((t_tile, fold * _IN), lambda i: (i, 0)),        # streamed x
            pl.BlockSpec((fold * _IN, fold * _OUT), lambda i: (0, 0)),   # resident W_f (block-diag)
            pl.BlockSpec((1, fold * _OUT), lambda i: (0, 0)),            # resident b_f
        ],
        out_specs=pl.BlockSpec((t_tile, fold * _OUT), lambda i: (i, 0)),
        compiler_params=pltpu.CompilerParams(
            dimension_semantics=("parallel",),     # megacore sharding on v7x
            vmem_limit_bytes=32 * 1024 * 1024,     # explicit, safe on v5e/v6e/v7x
        ),
    )(xf, w_big, b_big)

    return out.reshape(B, _OUT)                # free un-fold back to [B, 2]


def linear_net_reference(sim, params):
    """Plain-JAX 3-layer reference (same semantics as the PyTorch module)."""
    w1, b1, w2, b2, w3, b3 = params
    x = sim.reshape(sim.shape[0], _IN).astype(jnp.float32)
    hp = jax.lax.Precision.HIGHEST
    h1 = jnp.dot(x, w1, precision=hp) + b1
    h2 = jnp.dot(h1, w2, precision=hp) + b2
    return jnp.dot(h2, w3, precision=hp) + b3


def init_params(key):
    """Deterministic init mimicking nn.Linear default: U(-1/sqrt(fan_in), +)."""
    dims = [(64, 128), (128, 16), (16, 2)]
    params = []
    for fan_in, fan_out in dims:
        kw, kb, key = jax.random.split(key, 3)
        bound = 1.0 / math.sqrt(fan_in)
        # PyTorch stores weight as [out, in]; we keep [in, out] (y = x @ W is x @ W_torch.T).
        w = jax.random.uniform(kw, (fan_in, fan_out), jnp.float32, minval=-bound, maxval=bound)
        b = jax.random.uniform(kb, (1, fan_out), jnp.float32, minval=-bound, maxval=bound)
        params.extend([w, b])
    return tuple(params)


if __name__ == "__main__":
    key = jax.random.PRNGKey(0)
    k1, k2, kp = jax.random.split(key, 3)
    params = init_params(kp)

    # 1) fold=64 lane-dense path (B multiple of 64): [4, 4096] @ [4096, 128] kernel.
    B1 = 256
    sim1 = jax.random.normal(k1, (B1, 64, 1), dtype=jnp.float32)
    out1 = jax.block_until_ready(linear_net_forward(sim1, params))
    ref1 = linear_net_reference(sim1, params)
    assert out1.shape == (B1, 2)
    assert jnp.allclose(out1, ref1, atol=5e-3, rtol=5e-3), \
        float(jnp.max(jnp.abs(out1 - ref1)))

    # 2) Ragged batch (fold=8 fallback), multi-step grid with a masked last block
    #    (exercises the pad-free cdiv grid path).
    B2 = 200
    sim2 = jax.random.normal(k2, (B2, 64, 1), dtype=jnp.float32)
    out2 = jax.block_until_ready(linear_net_forward(sim2, params, tile_rows_max=64))
    ref2 = linear_net_reference(sim2, params)
    assert out2.shape == (B2, 2)
    assert jnp.allclose(out2, ref2, atol=5e-3, rtol=5e-3), \
        float(jnp.max(jnp.abs(out2 - ref2)))

    # 3) Producer already emits bf16 -> streamed as bf16 (no wrapper cast pass),
    #    f32 accumulation + f32 bias; looser tolerance for bf16 inputs/weights.
    out3 = jax.block_until_ready(linear_net_forward(sim1.astype(jnp.bfloat16), params))
    assert out3.shape == (B1, 2)
    assert jnp.allclose(out3, ref1, atol=3e-2, rtol=3e-2), \
        float(jnp.max(jnp.abs(out3 - ref1)))

    print("KERNEL_OK")
</pallas_src>

<mosaic_0001>
module attributes {stable_mosaic.version = 11 : i64} {
  func.func @_fused_affine_kernel(%arg0: i32, %arg1: memref<8x4096xf32, #tpu.memory_space<vmem>>, %arg2: memref<4096x128xf32, #tpu.memory_space<vmem>>, %arg3: memref<1x128xf32, #tpu.memory_space<vmem>>, %arg4: memref<8x128xf32, #tpu.memory_space<vmem>>) attributes {dimension_semantics = [#tpu.dimension_semantics<parallel>], iteration_bounds = array<i64: 1>, scalar_prefetch = 0 : i64, scratch_operands = 0 : i64, tpu.core_type = #tpu.core_type<tc>, window_params = [{transform_indices = @transform_0, window_bounds = array<i64: 8, 4096>}, {pipeline_mode = #tpu.pipeline_mode<synchronous>, transform_indices = @transform_1, window_bounds = array<i64: 4096, 128>}, {pipeline_mode = #tpu.pipeline_mode<synchronous>, transform_indices = @transform_2, window_bounds = array<i64: 1, 128>}, {transform_indices = @transform_3, window_bounds = array<i64: 8, 128>}]} {
    %c0 = arith.constant 0 : index
    %c0_0 = arith.constant 0 : index
    %0 = vector.load %arg1[%c0, %c0_0] : memref<8x4096xf32, #tpu.memory_space<vmem>>, vector<8x4096xf32>
    %c0_1 = arith.constant 0 : index
    %c0_2 = arith.constant 0 : index
    %1 = vector.load %arg2[%c0_1, %c0_2] : memref<4096x128xf32, #tpu.memory_space<vmem>>, vector<4096x128xf32>
    %cst = arith.constant dense<0.000000e+00> : vector<8x128xf32>
    %2 = tpu.matmul %0, %1, %cst {dimension_numbers = #tpu.dot_dimension_numbers<[1], [0], [0], [1], [0, 0, 1, 1], [], []>} : vector<8x4096xf32>, vector<4096x128xf32>, vector<8x128xf32> -> vector<8x128xf32>
    %c0_3 = arith.constant 0 : index
    %c0_4 = arith.constant 0 : index
    %3 = vector.load %arg3[%c0_3, %c0_4] : memref<1x128xf32, #tpu.memory_space<vmem>>, vector<1x128xf32>
    %4 = vector.broadcast %3 : vector<1x128xf32> to vector<8x128xf32>
    %5 = arith.addf %2, %4 : vector<8x128xf32>
    %c0_5 = arith.constant 0 : index
    %c0_6 = arith.constant 0 : index
    %6 = vector.load %arg4[%c0_5, %c0_6] : memref<8x128xf32, #tpu.memory_space<vmem>>, vector<8x128xf32>
    tpu.vector_store %arg4[%c0_5, %c0_6], %5 {strides = array<i32>} : memref<8x128xf32, #tpu.memory_space<vmem>>, vector<8x128xf32>,
    return
  }
  func.func @transform_0(%arg0: i32) -> (i32, i32) {
    %c0_i32 = arith.constant 0 : i32
    %c0_i32_0 = arith.constant 0 : i32
    return %arg0, %c0_i32 : i32, i32
  }
  func.func @transform_1(%arg0: i32) -> (i32, i32) {
    %c0_i32 = arith.constant 0 : i32
    %c0_i32_0 = arith.constant 0 : i32
    %c0_i32_1 = arith.constant 0 : i32
    return %c0_i32, %c0_i32_0 : i32, i32
  }
  func.func @transform_2(%arg0: i32) -> (i32, i32) {
    %c0_i32 = arith.constant 0 : i32
    %c0_i32_0 = arith.constant 0 : i32
    %c0_i32_1 = arith.constant 0 : i32
    return %c0_i32, %c0_i32_0 : i32, i32
  }
  func.func @transform_3(%arg0: i32) -> (i32, i32) {
    %c0_i32 = arith.constant 0 : i32
    %c0_i32_0 = arith.constant 0 : i32
    return %arg0, %c0_i32 : i32, i32
  }
}

</mosaic_0001>

<bundles_post_ra>
// kernel: tpu_custom_call.1
= control target key start
LH: loop header
LB: loop body
LE: loop exit
PB: predicated region body
PF: predicated region fallthrough
CT: control target
= control target key end

     0   :  { %8 = vsyncpa [#allocation3], 0  ;;  %s2537_s0 = inlined_call_operand.hbm [shape: f32[4,4096], index: 0, kind: input, shape index: {}]   ;;  %s2538_s1 = inlined_call_operand.hbm [shape: f32[4096,128], index: 1, kind: input, shape index: {}]   ;;  %s2539_s2 = inlined_call_operand.hbm [shape: f32[1,128], index: 2, kind: input, shape index: {}]   ;;  %s2540_s3 = inlined_call_operand.hbm [shape: f32[4,128], index: 3, kind: output, shape index: {}]  }
   0x1   :  { %9 = vsyncpa [#allocation6], 0 }
   0x2   :  { %10 = vsyncpa [#allocation4], 0 }
   0x3   :  { %15 = vsyncadd [#allocation3], 2048  ;;  %s2496_s12 = smov [#allocation5]  }
   0x4   :  { %s28_s13 = sshll.u32 %s2496_s12, 4  ;;  %s29_s13 = int_to_ptr.vmem [resolvable:$true] %s28_s13 }
   0x5   :  { %s2418_s14 = scalar_lea.vmem %s29_s13, 65536  ;;  %p2423_p1 = scmp.lt.s32.totalorder %s29_s13, %s29_s13 }
   0x6   :  { %p2419_p0 = scmp.ne.s32.totalorder %s29_s13, %s2418_s14  ;;  %p2424_p2 = scmp.lt.s32.totalorder %s2418_s14, %s2418_s14 }
   0x8   :  { %p2425_p3 = por %p2424_p2, %p2423_p1 }
   0xa   :  { %p2426_p4 = pnand %p2425_p3, %p2419_p0 }
   0xc   :  { %2429 = shalt.err (!%p2426_p4)
}
   0xd   :  { %s2497_s15 = smov 128   ;;  %s2498_s16 = smov 8  }
   0xe   :  { %34 = dma.hbm_to_vmem [thread:$0]  %s2538_s1, 65536, %s29_s13, [#allocation6], %s2497_s15, %s2497_s15, %s2498_s16  }
   0xf   :  { %s2499_s19 = smov [#allocation2]  }
  0x10   :  { %s16_s20 = sshll.u32 %s2499_s19, 4  ;;  %s17_s20 = int_to_ptr.vmem [resolvable:$true] %s16_s20 }
  0x11   :  { %s2438_s21 = scalar_lea.vmem %s17_s20, 2048  ;;  %s2442_s22 = scalar_lea.vmem %s17_s20, 4096 }
  0x12   :  { %p2439_p5 = scmp.ne.s32.totalorder %s17_s20, %s2438_s21  ;;  %p2443_p6 = scmp.lt.s32.totalorder %s17_s20, %s17_s20 }
  0x13   :  { %p2444_p7 = scmp.lt.s32.totalorder %s2442_s22, %s2438_s21 }
  0x15   :  { %p2445_p8 = por %p2444_p7, %p2443_p6 }
  0x17   :  { %p2446_p9 = pnand %p2445_p8, %p2439_p5 }
  0x19   :  { %2449 = shalt.err (!%p2446_p9)
}
  0x1a   :  { %s2500_s23 = smov 2048   ;;  %s2501_s26 = smov [#allocation7]  }
  0x1b   :  { %22 = dma.hbm_to_vmem [thread:$0]  %s2537_s0, 2048, %s17_s20, [#allocation3], %s2500_s23, %s2500_s23, %s2497_s15  }
  0x1c   :  { %s41_s27 = sshll.u32 %s2501_s26, 4  ;;  %s42_s27 = int_to_ptr.vmem [resolvable:$true] %s41_s27 }
  0x1d   :  { %s2458_s1 = scalar_lea.vmem %s42_s27, 16  ;;  %s2462_s28 = scalar_lea.vmem %s42_s27, 32 }
  0x1e   :  { %p2459_p10 = scmp.ne.s32.totalorder %s42_s27, %s2458_s1  ;;  %p2463_p11 = scmp.lt.s32.totalorder %s42_s27, %s42_s27 }
  0x1f   :  { %p2464_p12 = scmp.lt.s32.totalorder %s2462_s28, %s2458_s1 }
  0x21   :  { %p2465_p13 = por %p2464_p12, %p2463_p11 }
  0x23   :  { %p2466_p0 = pnand %p2465_p13, %p2459_p10 }
  0x25   :  { %2469 = shalt.err (!%p2466_p0)
}
  0x26   :  { %44 = dma.hbm_to_vmem [thread:$0]  %s2539_s2, 16, %s42_s27, [#allocation6]  }
  0x27   :  { %2490 = dma.done.wait [#allocation3], 4096  }
  0x28   :  { %2491 = vsyncadd [#allocation3], 4294963200 }
  0x29   :  { %2492 = dma.done.wait [#allocation6], 65552  }
  0x2a   :  { %2493 = vsyncadd [#allocation6], 4294901744  ;;  %v117_v0 = vld [vmem:[#allocation5 + $0xf8] sm:$0xff]  ;;  %v116_v4 = vld [vmem:[#allocation5 + $0xf0] sm:$0xff] }
  0x2b   :  { %v149_v1 = vld [vmem:[#allocation5 + $0x1f8] sm:$0xff]  ;;  %1841 = vmatprep.subr.mxu0 %v117_v0  ;;  %v148_v5 = vld [vmem:[#allocation5 + $0x1f0] sm:$0xff]  ;;  %v115_v8 = vld [vmem:[#allocation5 + $0xe8] sm:$0xff] }
  0x2c   :  { %v101_v2 = vld [vmem:[#allocation5 + $0x78] sm:$0xff]  ;;  %1876 = vmatprep.subr.mxu1 %v149_v1  ;;  %v100_v6 = vld [vmem:[#allocation5 + $0x70] sm:$0xff]  ;;  %v147_v9 = vld [vmem:[#allocation5 + $0x1e8] sm:$0xff] }
  0x2d   :  { %v133_v3 = vld [vmem:[#allocation5 + $0x178] sm:$0xff]  ;;  %1842 = vmatpush3.msra.mxu0 %v101_v2  ;;  %v132_v7 = vld [vmem:[#allocation5 + $0x170] sm:$0xff]  ;;  %v99_v10 = vld [vmem:[#allocation5 + $0x68] sm:$0xff] }
  0x2e   :  { %1877 = vmatpush3.msra.mxu1 %v133_v3  ;;  %1843 = vmatprep.subr.mxu0 %v116_v4  ;;  %v131_v11 = vld [vmem:[#allocation5 + $0x168] sm:$0xff]  ;;  %v114_v12 = vld [vmem:[#allocation5 + $0xe0] sm:$0xff]  ;;  %v113_v16 = vld [vmem:[#allocation5 + $0xd8] sm:$0xff] }
  0x2f   :  { %1878 = vmatprep.subr.mxu1 %v148_v5  ;;  %1844 = vmatpush3.msra.mxu0 %v100_v6  ;;  %v146_v13 = vld [vmem:[#allocation5 + $0x1e0] sm:$0xff]  ;;  %v145_v17 = vld [vmem:[#allocation5 + $0x1d8] sm:$0xff]  ;;  %v112_v20 = vld [vmem:[#allocation5 + $0xd0] sm:$0xff] }
  0x30   :  { %1879 = vmatpush3.msra.mxu1 %v132_v7  ;;  %1845 = vmatprep.subr.mxu0 %v115_v8  ;;  %v98_v14 = vld [vmem:[#allocation5 + $0x60] sm:$0xff]  ;;  %v97_v18 = vld [vmem:[#allocation5 + $0x58] sm:$0xff]  ;;  %v144_v21 = vld [vmem:[#allocation5 + $0x1d0] sm:$0xff] }
  0x31   :  { %1880 = vmatprep.subr.mxu1 %v147_v9  ;;  %v130_v15 = vld [vmem:[#allocation5 + $0x160] sm:$0xff]  ;;  %1846 = vmatpush3.msra.mxu0 %v99_v10  ;;  %v129_v19 = vld [vmem:[#allocation5 + $0x158] sm:$0xff]  ;;  %v96_v22 = vld [vmem:[#allocation5 + $0x50] sm:$0xff] }
  0x32   :  { %1881 = vmatpush3.msra.mxu1 %v131_v11  ;;  %1847 = vmatprep.subr.mxu0 %v114_v12  ;;  %v128_v23 = vld [vmem:[#allocation5 + $0x150] sm:$0xff]  ;;  %v111_v24 = vld [vmem:[#allocation5 + $0xc8] sm:$0xff]  ;;  %v110_v28 = vld [vmem:[#allocation5 + $0xc0] sm:$0xff] }
  0x33   :  { %1882 = vmatprep.subr.mxu1 %v146_v13  ;;  %1848 = vmatpush3.msra.mxu0 %v98_v14  ;;  %v143_v25 = vld [vmem:[#allocation5 + $0x1c8] sm:$0xff]  ;;  %v142_v29 = vld [vmem:[#allocation5 + $0x1c0] sm:$0xff]  ;;  %v109_v32 = vld [vmem:[#allocation5 + $0xb8] sm:$0xff] }
  0x34   :  { %1883 = vmatpush3.msra.mxu1 %v130_v15  ;;  %1849 = vmatprep.subr.mxu0 %v113_v16  ;;  %v95_v26 = vld [vmem:[#allocation5 + $0x48] sm:$0xff]  ;;  %v94_v30 = vld [vmem:[#allocation5 + $0x40] sm:$0xff]  ;;  %v141_v33 = vld [vmem:[#allocation5 + $0x1b8] sm:$0xff] }
  0x35   :  { %1884 = vmatprep.subr.mxu1 %v145_v17  ;;  %1850 = vmatpush3.msra.mxu0 %v97_v18  ;;  %v127_v27 = vld [vmem:[#allocation5 + $0x148] sm:$0xff]  ;;  %v126_v31 = vld [vmem:[#allocation5 + $0x140] sm:$0xff]  ;;  %v93_v34 = vld [vmem:[#allocation5 + $0x38] sm:$0xff] }
  0x36   :  { %1885 = vmatpush3.msra.mxu1 %v129_v19  ;;  %1851 = vmatprep.subr.mxu0 %v112_v20  ;;  %v125_v35 = vld [vmem:[#allocation5 + $0x138] sm:$0xff]  ;;  %v108_v36 = vld [vmem:[#allocation5 + $0xb0] sm:$0xff]  ;;  %v107_v40 = vld [vmem:[#allocation5 + $0xa8] sm:$0xff] }
  0x37   :  { %1886 = vmatprep.subr.mxu1 %v144_v21  ;;  %1852 = vmatpush3.msra.mxu0 %v96_v22  ;;  %v140_v37 = vld [vmem:[#allocation5 + $0x1b0] sm:$0xff]  ;;  %v139_v41 = vld [vmem:[#allocation5 + $0x1a8] sm:$0xff]  ;;  %v106_v44 = vld [vmem:[#allocation5 + $0xa0] sm:$0xff] }
  0x38   :  { %1887 = vmatpush3.msra.mxu1 %v128_v23  ;;  %1853 = vmatprep.subr.mxu0 %v111_v24  ;;  %v92_v38 = vld [vmem:[#allocation5 + $0x30] sm:$0xff]  ;;  %v91_v42 = vld [vmem:[#allocation5 + $0x28] sm:$0xff]  ;;  %v138_v45 = vld [vmem:[#allocation5 + $0x1a0] sm:$0xff] }
  0x39   :  { %1888 = vmatprep.subr.mxu1 %v143_v25  ;;  %1854 = vmatpush3.msra.mxu0 %v95_v26  ;;  %v124_v39 = vld [vmem:[#allocation5 + $0x130] sm:$0xff]  ;;  %v123_v43 = vld [vmem:[#allocation5 + $0x128] sm:$0xff]  ;;  %v90_v46 = vld [vmem:[#allocation5 + $0x20] sm:$0xff] }
  0x3a   :  { %1889 = vmatpush3.msra.mxu1 %v127_v27  ;;  %1855 = vmatprep.subr.mxu0 %v110_v28  ;;  %v122_v47 = vld [vmem:[#allocation5 + $0x120] sm:$0xff]  ;;  %v105_v48 = vld [vmem:[#allocation5 + $0x98] sm:$0xff]  ;;  %v104_v52 = vld [vmem:[#allocation5 + $0x90] sm:$0xff] }
  0x3b   :  { %1890 = vmatprep.subr.mxu1 %v142_v29  ;;  %1856 = vmatpush3.msra.mxu0 %v94_v30  ;;  %v137_v49 = vld [vmem:[#allocation5 + $0x198] sm:$0xff]  ;;  %v136_v53 = vld [vmem:[#allocation5 + $0x190] sm:$0xff]  ;;  %v54_v56 = vld [vmem:[#allocation2] sm:$0xff] }
  0x3c   :  { %1891 = vmatpush3.msra.mxu1 %v126_v31  ;;  %1857 = vmatprep.subr.mxu0 %v109_v32  ;;  %v89_v50 = vld [vmem:[#allocation5 + $0x18] sm:$0xff]  ;;  %v88_v54 = vld [vmem:[#allocation5 + $0x10] sm:$0xff]  ;;  %v70_v57 = vld [vmem:[#allocation2 + $0x80] sm:$0xff] }
  0x3d   :  { %1892 = vmatprep.subr.mxu1 %v141_v33  ;;  %1858 = vmatpush3.msra.mxu0 %v93_v34  ;;  %v121_v51 = vld [vmem:[#allocation5 + $0x118] sm:$0xff]  ;;  %v120_v55 = vld [vmem:[#allocation5 + $0x110] sm:$0xff]  ;;  %v103_v58 = vld [vmem:[#allocation5 + $0x88] sm:$0xff]  ;;  %v638_v2 = vcombine.high %v54_v56, %v70_v57  ;;  %v637_v4 = vcombine.low %v54_v56, %v70_v57 }
  0x3e   :  { %1893 = vmatpush3.msra.mxu1 %v125_v35  ;;  %1859 = vmatprep.subr.mxu0 %v108_v36  ;;  %v135_v59 = vld [vmem:[#allocation5 + $0x188] sm:$0xff]  ;;  %v102_v0 = vld [vmem:[#allocation5 + $0x80] sm:$0xff]  ;;  %v181_v8 = vld [vmem:[#allocation5 + $0x2f8] sm:$0xff] }
  0x3f   :  { %1894 = vmatprep.subr.mxu1 %v140_v37  ;;  %1860 = vmatpush3.msra.mxu0 %v92_v38  ;;  %v87_v60 = vld [vmem:[#allocation5 + $0x8] sm:$0xff]  ;;  %v134_v1 = vld [vmem:[#allocation5 + $0x180] sm:$0xff]  ;;  %v213_v9 = vld [vmem:[#allocation5 + $0x3f8] sm:$0xff] }
  0x40   :  { %1895 = vmatpush3.msra.mxu1 %v124_v39  ;;  %1861 = vmatprep.subr.mxu0 %v107_v40  ;;  %v119_v61 = vld [vmem:[#allocation5 + $0x108] sm:$0xff]  ;;  %v86_v3 = vld [vmem:[#allocation5] sm:$0xff]  ;;  %v165_v10 = vld [vmem:[#allocation5 + $0x278] sm:$0xff] }
  0x41   :  { %1896 = vmatprep.subr.mxu1 %v139_v41  ;;  %1862 = vmatpush3.msra.mxu0 %v91_v42  ;;  %v55_v62 = vld [vmem:[#allocation2 + $0x8] sm:$0xff]  ;;  %v118_v5 = vld [vmem:[#allocation5 + $0x100] sm:$0xff]  ;;  %v197_v11 = vld [vmem:[#allocation5 + $0x378] sm:$0xff] }
  0x42   :  { %1897 = vmatpush3.msra.mxu1 %v123_v43  ;;  %1863 = vmatprep.subr.mxu0 %v106_v44  ;;  %v71_v63 = vld [vmem:[#allocation2 + $0x88] sm:$0xff]  ;;  %v180_v12 = vld [vmem:[#allocation5 + $0x2f0] sm:$0xff]  ;;  %v178_v20 = vld [vmem:[#allocation5 + $0x2e0] sm:$0xff] }
  0x43   :  { %1898 = vmatprep.subr.mxu1 %v138_v45  ;;  %1864 = vmatpush3.msra.mxu0 %v90_v46  ;;  %v640_v6 = vcombine.high %v55_v62, %v71_v63  ;;  %v639_v7 = vcombine.low %v55_v62, %v71_v63  ;;  %v212_v13 = vld [vmem:[#allocation5 + $0x3f0] sm:$0xff]  ;;  %v179_v16 = vld [vmem:[#allocation5 + $0x2e8] sm:$0xff]  ;;  %v210_v21 = vld [vmem:[#allocation5 + $0x3e0] sm:$0xff] }
  0x44   :  { %1899 = vmatpush3.msra.mxu1 %v122_v47  ;;  %1865 = vmatprep.subr.mxu0 %v105_v48  ;;  %v164_v14 = vld [vmem:[#allocation5 + $0x270] sm:$0xff]  ;;  %v211_v17 = vld [vmem:[#allocation5 + $0x3e8] sm:$0xff]  ;;  %v162_v22 = vld [vmem:[#allocation5 + $0x260] sm:$0xff] }
  0x45   :  { %1900 = vmatprep.subr.mxu1 %v137_v49  ;;  %1866 = vmatpush3.msra.mxu0 %v89_v50  ;;  %v196_v15 = vld [vmem:[#allocation5 + $0x370] sm:$0xff]  ;;  %v163_v18 = vld [vmem:[#allocation5 + $0x268] sm:$0xff]  ;;  %v194_v23 = vld [vmem:[#allocation5 + $0x360] sm:$0xff] }
  0x46   :  { %1901 = vmatpush3.msra.mxu1 %v121_v51  ;;  %1867 = vmatprep.subr.mxu0 %v104_v52  ;;  %v195_v19 = vld [vmem:[#allocation5 + $0x368] sm:$0xff]  ;;  %v177_v24 = vld [vmem:[#allocation5 + $0x2d8] sm:$0xff]  ;;  %v176_v28 = vld [vmem:[#allocation5 + $0x2d0] sm:$0xff] }
  0x47   :  { %1902 = vmatprep.subr.mxu1 %v136_v53  ;;  %1868 = vmatpush3.msra.mxu0 %v88_v54  ;;  %v209_v25 = vld [vmem:[#allocation5 + $0x3d8] sm:$0xff]  ;;  %v208_v29 = vld [vmem:[#allocation5 + $0x3d0] sm:$0xff]  ;;  %v175_v32 = vld [vmem:[#allocation5 + $0x2c8] sm:$0xff] }
  0x48   :  { %1903 = vmatpush3.msra.mxu1 %v120_v55  ;;  %1869 = vmatprep.subr.mxu0 %v103_v58  ;;  %v161_v26 = vld [vmem:[#allocation5 + $0x258] sm:$0xff]  ;;  %v160_v30 = vld [vmem:[#allocation5 + $0x250] sm:$0xff]  ;;  %v207_v33 = vld [vmem:[#allocation5 + $0x3c8] sm:$0xff] }
  0x49   :  { %1904 = vmatprep.subr.mxu1 %v135_v59  ;;  %1870 = vmatpush3.msra.mxu0 %v87_v60  ;;  %v193_v27 = vld [vmem:[#allocation5 + $0x358] sm:$0xff]  ;;  %v192_v31 = vld [vmem:[#allocation5 + $0x350] sm:$0xff]  ;;  %v159_v34 = vld [vmem:[#allocation5 + $0x248] sm:$0xff] }
  0x4a   :  { %1905 = vmatpush3.msra.mxu1 %v119_v61  ;;  %1871 = vmatprep.subr.mxu0 %v102_v0  ;;  %v191_v35 = vld [vmem:[#allocation5 + $0x348] sm:$0xff]  ;;  %v174_v36 = vld [vmem:[#allocation5 + $0x2c0] sm:$0xff]  ;;  %v173_v40 = vld [vmem:[#allocation5 + $0x2b8] sm:$0xff] }
  0x4b   :  { %1906 = vmatprep.subr.mxu1 %v134_v1  ;;  %1872 = vmatpush3.msra.mxu0 %v86_v3  ;;  %v206_v37 = vld [vmem:[#allocation5 + $0x3c0] sm:$0xff]  ;;  %v205_v41 = vld [vmem:[#allocation5 + $0x3b8] sm:$0xff]  ;;  %v172_v44 = vld [vmem:[#allocation5 + $0x2b0] sm:$0xff] }
  0x4c   :  { %765 = vmatprep.mubr.f32.mxu0 %v638_v2  ;;  %1907 = vmatpush3.msra.mxu1 %v118_v5  ;;  %v158_v38 = vld [vmem:[#allocation5 + $0x240] sm:$0xff]  ;;  %v157_v42 = vld [vmem:[#allocation5 + $0x238] sm:$0xff]  ;;  %v204_v45 = vld [vmem:[#allocation5 + $0x3b0] sm:$0xff] }
  0x4d   :  { %766 = vmatmul.mubr.f32.vlgmr.msra.gmra.mxu0 %v637_v4  ;;  %835 = vmatprep.mubr.f32.mxu1 %v640_v6  ;;  %v190_v39 = vld [vmem:[#allocation5 + $0x340] sm:$0xff]  ;;  %v189_v43 = vld [vmem:[#allocation5 + $0x338] sm:$0xff]  ;;  %v156_v46 = vld [vmem:[#allocation5 + $0x230] sm:$0xff] }
  0x4e   :  { %1911 = vmatprep.subr.mxu0 %v181_v8  ;;  %1946 = vmatprep.subr.mxu1 %v213_v9  ;;  %v188_v47 = vld [vmem:[#allocation5 + $0x330] sm:$0xff]  ;;  %v171_v48 = vld [vmem:[#allocation5 + $0x2a8] sm:$0xff]  ;;  %v170_v52 = vld [vmem:[#allocation5 + $0x2a0] sm:$0xff] }
  0x4f   :  { %836 = vmatmul.mubr.f32.vlgmr.msra.gmra.mxu1 %v639_v7  ;;  %1912 = vmatpush3.msra.mxu0 %v165_v10  ;;  %v203_v49 = vld [vmem:[#allocation5 + $0x3a8] sm:$0xff]  ;;  %v202_v53 = vld [vmem:[#allocation5 + $0x3a0] sm:$0xff]  ;;  %v169_v56 = vld [vmem:[#allocation5 + $0x298] sm:$0xff] }
  0x50   :  { %1947 = vmatpush3.msra.mxu1 %v197_v11  ;;  %1913 = vmatprep.subr.mxu0 %v180_v12  ;;  %v155_v50 = vld [vmem:[#allocation5 + $0x228] sm:$0xff]  ;;  %v154_v54 = vld [vmem:[#allocation5 + $0x220] sm:$0xff]  ;;  %v201_v57 = vld [vmem:[#allocation5 + $0x398] sm:$0xff] }
  0x51   :  { %1948 = vmatprep.subr.mxu1 %v212_v13  ;;  %1914 = vmatpush3.msra.mxu0 %v164_v14  ;;  %v187_v51 = vld [vmem:[#allocation5 + $0x328] sm:$0xff]  ;;  %v186_v55 = vld [vmem:[#allocation5 + $0x320] sm:$0xff]  ;;  %v153_v58 = vld [vmem:[#allocation5 + $0x218] sm:$0xff] }
  0x52   :  { %1949 = vmatpush3.msra.mxu1 %v196_v15  ;;  %1915 = vmatprep.subr.mxu0 %v179_v16  ;;  %v185_v59 = vld [vmem:[#allocation5 + $0x318] sm:$0xff]  ;;  %v168_v60 = vld [vmem:[#allocation5 + $0x290] sm:$0xff]  ;;  %v167_v2 = vld [vmem:[#allocation5 + $0x288] sm:$0xff] }
  0x53   :  { %1950 = vmatprep.subr.mxu1 %v211_v17  ;;  %1916 = vmatpush3.msra.mxu0 %v163_v18  ;;  %v200_v61 = vld [vmem:[#allocation5 + $0x390] sm:$0xff]  ;;  %v199_v3 = vld [vmem:[#allocation5 + $0x388] sm:$0xff]  ;;  %v57_v6 = vld [vmem:[#allocation2 + $0x18] sm:$0xff] }
  0x54   :  { %1951 = vmatpush3.msra.mxu1 %v195_v19  ;;  %1917 = vmatprep.subr.mxu0 %v178_v20  ;;  %v152_v62 = vld [vmem:[#allocation5 + $0x210] sm:$0xff]  ;;  %v151_v4 = vld [vmem:[#allocation5 + $0x208] sm:$0xff]  ;;  %v73_v7 = vld [vmem:[#allocation2 + $0x98] sm:$0xff] }
  0x55   :  { %1952 = vmatprep.subr.mxu1 %v210_v21  ;;  %1918 = vmatpush3.msra.mxu0 %v162_v22  ;;  %v184_v63 = vld [vmem:[#allocation5 + $0x310] sm:$0xff]  ;;  %v183_v5 = vld [vmem:[#allocation5 + $0x308] sm:$0xff]  ;;  %v166_v8 = vld [vmem:[#allocation5 + $0x280] sm:$0xff]  ;;  %v644_v14 = vcombine.high %v57_v6, %v73_v7  ;;  %v643_v15 = vcombine.low %v57_v6, %v73_v7 }
  0x56   :  { %1953 = vmatpush3.msra.mxu1 %v194_v23  ;;  %1919 = vmatprep.subr.mxu0 %v177_v24  ;;  %v56_v0 = vld [vmem:[#allocation2 + $0x10] sm:$0xff]  ;;  %v198_v9 = vld [vmem:[#allocation5 + $0x380] sm:$0xff]  ;;  %v245_v16 = vld [vmem:[#allocation5 + $0x4f8] sm:$0xff] }
  0x57   :  { %1954 = vmatprep.subr.mxu1 %v209_v25  ;;  %1920 = vmatpush3.msra.mxu0 %v161_v26  ;;  %v72_v1 = vld [vmem:[#allocation2 + $0x90] sm:$0xff]  ;;  %v150_v11 = vld [vmem:[#allocation5 + $0x200] sm:$0xff]  ;;  %v277_v17 = vld [vmem:[#allocation5 + $0x5f8] sm:$0xff] }
  0x58   :  { %1955 = vmatpush3.msra.mxu1 %v193_v27  ;;  %1921 = vmatprep.subr.mxu0 %v176_v28  ;;  %v642_v10 = vcombine.high %v56_v0, %v72_v1  ;;  %v641_v12 = vcombine.low %v56_v0, %v72_v1  ;;  %v182_v13 = vld [vmem:[#allocation5 + $0x300] sm:$0xff]  ;;  %v229_v18 = vld [vmem:[#allocation5 + $0x478] sm:$0xff]  ;;  %v244_v20 = vld [vmem:[#allocation5 + $0x4f0] sm:$0xff] }
  0x59   :  { %1956 = vmatprep.subr.mxu1 %v208_v29  ;;  %1922 = vmatpush3.msra.mxu0 %v160_v30  ;;  %v261_v19 = vld [vmem:[#allocation5 + $0x578] sm:$0xff]  ;;  %v276_v21 = vld [vmem:[#allocation5 + $0x5f0] sm:$0xff]  ;;  %v243_v24 = vld [vmem:[#allocation5 + $0x4e8] sm:$0xff] }
  0x5a   :  { %1957 = vmatpush3.msra.mxu1 %v192_v31  ;;  %1923 = vmatprep.subr.mxu0 %v175_v32  ;;  %v228_v22 = vld [vmem:[#allocation5 + $0x470] sm:$0xff]  ;;  %v275_v25 = vld [vmem:[#allocation5 + $0x5e8] sm:$0xff]  ;;  %v242_v28 = vld [vmem:[#allocation5 + $0x4e0] sm:$0xff] }
  0x5b   :  { %1958 = vmatprep.subr.mxu1 %v207_v33  ;;  %1924 = vmatpush3.msra.mxu0 %v159_v34  ;;  %v260_v23 = vld [vmem:[#allocation5 + $0x570] sm:$0xff]  ;;  %v227_v26 = vld [vmem:[#allocation5 + $0x468] sm:$0xff]  ;;  %v274_v29 = vld [vmem:[#allocation5 + $0x5e0] sm:$0xff] }
  0x5c   :  { %1959 = vmatpush3.msra.mxu1 %v191_v35  ;;  %1925 = vmatprep.subr.mxu0 %v174_v36  ;;  %v259_v27 = vld [vmem:[#allocation5 + $0x568] sm:$0xff]  ;;  %v226_v30 = vld [vmem:[#allocation5 + $0x460] sm:$0xff]  ;;  %v241_v32 = vld [vmem:[#allocation5 + $0x4d8] sm:$0xff] }
  0x5d   :  { %1960 = vmatprep.subr.mxu1 %v206_v37  ;;  %1926 = vmatpush3.msra.mxu0 %v158_v38  ;;  %v258_v31 = vld [vmem:[#allocation5 + $0x560] sm:$0xff]  ;;  %v273_v33 = vld [vmem:[#allocation5 + $0x5d8] sm:$0xff]  ;;  %v240_v36 = vld [vmem:[#allocation5 + $0x4d0] sm:$0xff] }
  0x5e   :  { %1961 = vmatpush3.msra.mxu1 %v190_v39  ;;  %1927 = vmatprep.subr.mxu0 %v173_v40  ;;  %v225_v34 = vld [vmem:[#allocation5 + $0x458] sm:$0xff]  ;;  %v272_v37 = vld [vmem:[#allocation5 + $0x5d0] sm:$0xff]  ;;  %v239_v40 = vld [vmem:[#allocation5 + $0x4c8] sm:$0xff] }
  0x5f   :  { %1962 = vmatprep.subr.mxu1 %v205_v41  ;;  %1928 = vmatpush3.msra.mxu0 %v157_v42  ;;  %v257_v35 = vld [vmem:[#allocation5 + $0x558] sm:$0xff]  ;;  %v224_v38 = vld [vmem:[#allocation5 + $0x450] sm:$0xff]  ;;  %v271_v41 = vld [vmem:[#allocation5 + $0x5c8] sm:$0xff] }
  0x60   :  { %1963 = vmatpush3.msra.mxu1 %v189_v43  ;;  %1929 = vmatprep.subr.mxu0 %v172_v44  ;;  %v256_v39 = vld [vmem:[#allocation5 + $0x550] sm:$0xff]  ;;  %v223_v42 = vld [vmem:[#allocation5 + $0x448] sm:$0xff]  ;;  %v238_v44 = vld [vmem:[#allocation5 + $0x4c0] sm:$0xff] }
  0x61   :  { %1964 = vmatprep.subr.mxu1 %v204_v45  ;;  %1930 = vmatpush3.msra.mxu0 %v156_v46  ;;  %v255_v43 = vld [vmem:[#allocation5 + $0x548] sm:$0xff]  ;;  %v270_v45 = vld [vmem:[#allocation5 + $0x5c0] sm:$0xff]  ;;  %v233_v0 = vld [vmem:[#allocation5 + $0x498] sm:$0xff] }
  0x62   :  { %1965 = vmatpush3.msra.mxu1 %v188_v47  ;;  %1931 = vmatprep.subr.mxu0 %v171_v48  ;;  %v222_v46 = vld [vmem:[#allocation5 + $0x440] sm:$0xff]  ;;  %v237_v48 = vld [vmem:[#allocation5 + $0x4b8] sm:$0xff]  ;;  %v216_v6 = vld [vmem:[#allocation5 + $0x410] sm:$0xff] }
  0x63   :  { %1966 = vmatprep.subr.mxu1 %v203_v49  ;;  %1932 = vmatpush3.msra.mxu0 %v155_v50  ;;  %v254_v47 = vld [vmem:[#allocation5 + $0x540] sm:$0xff]  ;;  %v269_v49 = vld [vmem:[#allocation5 + $0x5b8] sm:$0xff]  ;;  %v248_v7 = vld [vmem:[#allocation5 + $0x510] sm:$0xff] }
  0x64   :  { %1967 = vmatpush3.msra.mxu1 %v187_v51  ;;  %1933 = vmatprep.subr.mxu0 %v170_v52  ;;  %v221_v50 = vld [vmem:[#allocation5 + $0x438] sm:$0xff]  ;;  %v236_v52 = vld [vmem:[#allocation5 + $0x4b0] sm:$0xff] }
  0x65   :  { %1968 = vmatprep.subr.mxu1 %v202_v53  ;;  %1934 = vmatpush3.msra.mxu0 %v154_v54  ;;  %v253_v51 = vld [vmem:[#allocation5 + $0x538] sm:$0xff]  ;;  %v268_v53 = vld [vmem:[#allocation5 + $0x5b0] sm:$0xff] }
  0x66   :  { %1969 = vmatpush3.msra.mxu1 %v186_v55  ;;  %1935 = vmatprep.subr.mxu0 %v169_v56  ;;  %v220_v54 = vld [vmem:[#allocation5 + $0x430] sm:$0xff]  ;;  %v235_v56 = vld [vmem:[#allocation5 + $0x4a8] sm:$0xff]  ;;  %v265_v1 = vld [vmem:[#allocation5 + $0x598] sm:$0xff] }
  0x67   :  { %1970 = vmatprep.subr.mxu1 %v201_v57  ;;  %1936 = vmatpush3.msra.mxu0 %v153_v58  ;;  %v252_v55 = vld [vmem:[#allocation5 + $0x530] sm:$0xff]  ;;  %v267_v57 = vld [vmem:[#allocation5 + $0x5a8] sm:$0xff] }
  0x68   :  { %1971 = vmatpush3.msra.mxu1 %v185_v59  ;;  %1937 = vmatprep.subr.mxu0 %v168_v60  ;;  %v219_v58 = vld [vmem:[#allocation5 + $0x428] sm:$0xff]  ;;  %v234_v60 = vld [vmem:[#allocation5 + $0x4a0] sm:$0xff] }
  0x69   :  { %1972 = vmatprep.subr.mxu1 %v200_v61  ;;  %1938 = vmatpush3.msra.mxu0 %v152_v62  ;;  %v251_v59 = vld [vmem:[#allocation5 + $0x528] sm:$0xff]  ;;  %v266_v61 = vld [vmem:[#allocation5 + $0x5a0] sm:$0xff] }
  0x6a   :  { %1973 = vmatpush3.msra.mxu1 %v184_v63  ;;  %1939 = vmatprep.subr.mxu0 %v167_v2  ;;  %v218_v62 = vld [vmem:[#allocation5 + $0x420] sm:$0xff]  ;;  %v217_v2 = vld [vmem:[#allocation5 + $0x418] sm:$0xff] }
  0x6b   :  { %1974 = vmatprep.subr.mxu1 %v199_v3  ;;  %1940 = vmatpush3.msra.mxu0 %v151_v4  ;;  %v250_v63 = vld [vmem:[#allocation5 + $0x520] sm:$0xff]  ;;  %v249_v3 = vld [vmem:[#allocation5 + $0x518] sm:$0xff]  ;;  %v232_v4 = vld [vmem:[#allocation5 + $0x490] sm:$0xff] }
  0x6c   :  { %1975 = vmatpush3.msra.mxu1 %v183_v5  ;;  %1941 = vmatprep.subr.mxu0 %v166_v8  ;;  %v264_v5 = vld [vmem:[#allocation5 + $0x590] sm:$0xff]  ;;  %v58_v8 = vld [vmem:[#allocation2 + $0x20] sm:$0xff] }
  0x6d   :  { %1976 = vmatprep.subr.mxu1 %v198_v9  ;;  %1942 = vmatpush3.msra.mxu0 %v150_v11  ;;  %v74_v9 = vld [vmem:[#allocation2 + $0xa0] sm:$0xff]  ;;  %v263_v11 = vld [vmem:[#allocation5 + $0x588] sm:$0xff] }
  0x6e   :  { %905 = vmatprep.mubr.f32.mxu0 %v642_v10  ;;  %1977 = vmatpush3.msra.mxu1 %v182_v13  ;;  %v231_v10 = vld [vmem:[#allocation5 + $0x488] sm:$0xff] }
  0x6f   :  { %906 = vmatmul.mubr.f32.vlgmr.msra.gmra.mxu0 %v641_v12  ;;  %975 = vmatprep.mubr.f32.mxu1 %v644_v14  ;;  %v215_v12 = vld [vmem:[#allocation5 + $0x408] sm:$0xff] }
  0x70   :  { %1981 = vmatprep.subr.mxu0 %v245_v16  ;;  %2016 = vmatprep.subr.mxu1 %v277_v17  ;;  %v247_v13 = vld [vmem:[#allocation5 + $0x508] sm:$0xff]  ;;  %v230_v16 = vld [vmem:[#allocation5 + $0x480] sm:$0xff] }
  0x71   :  { %976 = vmatmul.mubr.f32.vlgmr.msra.gmra.mxu1 %v643_v15  ;;  %1982 = vmatpush3.msra.mxu0 %v229_v18  ;;  %v59_v14 = vld [vmem:[#allocation2 + $0x28] sm:$0xff]  ;;  %v262_v17 = vld [vmem:[#allocation5 + $0x580] sm:$0xff]  ;;  %v646_v18 = vcombine.high %v58_v8, %v74_v9 }
  0x72   :  { %2017 = vmatpush3.msra.mxu1 %v261_v19  ;;  %1983 = vmatprep.subr.mxu0 %v244_v20  ;;  %v75_v15 = vld [vmem:[#allocation2 + $0xa8] sm:$0xff]  ;;  %v214_v19 = vld [vmem:[#allocation5 + $0x400] sm:$0xff]  ;;  %v645_v20 = vcombine.low %v58_v8, %v74_v9  ;;  %v297_v8 = vld [vmem:[#allocation5 + $0x698] sm:$0xff] }
  0x73   :  { %2018 = vmatprep.subr.mxu1 %v276_v21  ;;  %1984 = vmatpush3.msra.mxu0 %v228_v22  ;;  %v246_v21 = vld [vmem:[#allocation5 + $0x500] sm:$0xff]  ;;  %v648_v22 = vcombine.high %v59_v14, %v75_v15  ;;  %v329_v9 = vld [vmem:[#allocation5 + $0x798] sm:$0xff] }
  0x74   :  { %2019 = vmatpush3.msra.mxu1 %v260_v23  ;;  %1985 = vmatprep.subr.mxu0 %v243_v24  ;;  %v647_v23 = vcombine.low %v59_v14, %v75_v15  ;;  %v309_v24 = vld [vmem:[#allocation5 + $0x6f8] sm:$0xff]  ;;  %v280_v14 = vld [vmem:[#allocation5 + $0x610] sm:$0xff] }
  0x75   :  { %2020 = vmatprep.subr.mxu1 %v275_v25  ;;  %1986 = vmatpush3.msra.mxu0 %v227_v26  ;;  %v341_v25 = vld [vmem:[#allocation5 + $0x7f8] sm:$0xff]  ;;  %v312_v15 = vld [vmem:[#allocation5 + $0x710] sm:$0xff] }
  0x76   :  { %2021 = vmatpush3.msra.mxu1 %v259_v27  ;;  %1987 = vmatprep.subr.mxu0 %v242_v28  ;;  %v293_v26 = vld [vmem:[#allocation5 + $0x678] sm:$0xff]  ;;  %v308_v28 = vld [vmem:[#allocation5 + $0x6f0] sm:$0xff] }
  0x77   :  { %2022 = vmatprep.subr.mxu1 %v274_v29  ;;  %1988 = vmatpush3.msra.mxu0 %v226_v30  ;;  %v325_v27 = vld [vmem:[#allocation5 + $0x778] sm:$0xff]  ;;  %v340_v29 = vld [vmem:[#allocation5 + $0x7f0] sm:$0xff] }
  0x78   :  { %2023 = vmatpush3.msra.mxu1 %v258_v31  ;;  %1989 = vmatprep.subr.mxu0 %v241_v32  ;;  %v292_v30 = vld [vmem:[#allocation5 + $0x670] sm:$0xff]  ;;  %v307_v32 = vld [vmem:[#allocation5 + $0x6e8] sm:$0xff] }
  0x79   :  { %2024 = vmatprep.subr.mxu1 %v273_v33  ;;  %1990 = vmatpush3.msra.mxu0 %v225_v34  ;;  %v324_v31 = vld [vmem:[#allocation5 + $0x770] sm:$0xff]  ;;  %v339_v33 = vld [vmem:[#allocation5 + $0x7e8] sm:$0xff] }
  0x7a   :  { %2025 = vmatpush3.msra.mxu1 %v257_v35  ;;  %1991 = vmatprep.subr.mxu0 %v240_v36  ;;  %v291_v34 = vld [vmem:[#allocation5 + $0x668] sm:$0xff]  ;;  %v306_v36 = vld [vmem:[#allocation5 + $0x6e0] sm:$0xff] }
  0x7b   :  { %2026 = vmatprep.subr.mxu1 %v272_v37  ;;  %1992 = vmatpush3.msra.mxu0 %v224_v38  ;;  %v323_v35 = vld [vmem:[#allocation5 + $0x768] sm:$0xff]  ;;  %v338_v37 = vld [vmem:[#allocation5 + $0x7e0] sm:$0xff] }
  0x7c   :  { %2027 = vmatpush3.msra.mxu1 %v256_v39  ;;  %1993 = vmatprep.subr.mxu0 %v239_v40  ;;  %v290_v38 = vld [vmem:[#allocation5 + $0x660] sm:$0xff]  ;;  %v305_v40 = vld [vmem:[#allocation5 + $0x6d8] sm:$0xff] }
  0x7d   :  { %2028 = vmatprep.subr.mxu1 %v271_v41  ;;  %1994 = vmatpush3.msra.mxu0 %v223_v42  ;;  %v322_v39 = vld [vmem:[#allocation5 + $0x760] sm:$0xff]  ;;  %v337_v41 = vld [vmem:[#allocation5 + $0x7d8] sm:$0xff] }
  0x7e   :  { %2029 = vmatpush3.msra.mxu1 %v255_v43  ;;  %1995 = vmatprep.subr.mxu0 %v238_v44  ;;  %v289_v42 = vld [vmem:[#allocation5 + $0x658] sm:$0xff]  ;;  %v304_v44 = vld [vmem:[#allocation5 + $0x6d0] sm:$0xff] }
  0x7f   :  { %2030 = vmatprep.subr.mxu1 %v270_v45  ;;  %1996 = vmatpush3.msra.mxu0 %v222_v46  ;;  %v321_v43 = vld [vmem:[#allocation5 + $0x758] sm:$0xff]  ;;  %v336_v45 = vld [vmem:[#allocation5 + $0x7d0] sm:$0xff] }
  0x80   :  { %2031 = vmatpush3.msra.mxu1 %v254_v47  ;;  %1997 = vmatprep.subr.mxu0 %v237_v48  ;;  %v288_v46 = vld [vmem:[#allocation5 + $0x650] sm:$0xff]  ;;  %v303_v48 = vld [vmem:[#allocation5 + $0x6c8] sm:$0xff] }
  0x81   :  { %2032 = vmatprep.subr.mxu1 %v269_v49  ;;  %1998 = vmatpush3.msra.mxu0 %v221_v50  ;;  %v320_v47 = vld [vmem:[#allocation5 + $0x750] sm:$0xff]  ;;  %v335_v49 = vld [vmem:[#allocation5 + $0x7c8] sm:$0xff] }
  0x82   :  { %2033 = vmatpush3.msra.mxu1 %v253_v51  ;;  %1999 = vmatprep.subr.mxu0 %v236_v52  ;;  %v287_v50 = vld [vmem:[#allocation5 + $0x648] sm:$0xff]  ;;  %v302_v52 = vld [vmem:[#allocation5 + $0x6c0] sm:$0xff] }
  0x83   :  { %2034 = vmatprep.subr.mxu1 %v268_v53  ;;  %2000 = vmatpush3.msra.mxu0 %v220_v54  ;;  %v319_v51 = vld [vmem:[#allocation5 + $0x748] sm:$0xff]  ;;  %v334_v53 = vld [vmem:[#allocation5 + $0x7c0] sm:$0xff] }
  0x84   :  { %2035 = vmatpush3.msra.mxu1 %v252_v55  ;;  %2001 = vmatprep.subr.mxu0 %v235_v56  ;;  %v286_v54 = vld [vmem:[#allocation5 + $0x640] sm:$0xff]  ;;  %v301_v56 = vld [vmem:[#allocation5 + $0x6b8] sm:$0xff] }
  0x85   :  { %2036 = vmatprep.subr.mxu1 %v267_v57  ;;  %2002 = vmatpush3.msra.mxu0 %v219_v58  ;;  %v318_v55 = vld [vmem:[#allocation5 + $0x740] sm:$0xff]  ;;  %v333_v57 = vld [vmem:[#allocation5 + $0x7b8] sm:$0xff] }
  0x86   :  { %2037 = vmatpush3.msra.mxu1 %v251_v59  ;;  %2003 = vmatprep.subr.mxu0 %v234_v60  ;;  %v285_v58 = vld [vmem:[#allocation5 + $0x638] sm:$0xff]  ;;  %v300_v60 = vld [vmem:[#allocation5 + $0x6b0] sm:$0xff] }
  0x87   :  { %2038 = vmatprep.subr.mxu1 %v266_v61  ;;  %2004 = vmatpush3.msra.mxu0 %v218_v62  ;;  %v317_v59 = vld [vmem:[#allocation5 + $0x738] sm:$0xff]  ;;  %v332_v61 = vld [vmem:[#allocation5 + $0x7b0] sm:$0xff] }
  0x88   :  { %2039 = vmatpush3.msra.mxu1 %v250_v63  ;;  %2005 = vmatprep.subr.mxu0 %v233_v0  ;;  %v284_v62 = vld [vmem:[#allocation5 + $0x630] sm:$0xff]  ;;  %v299_v0 = vld [vmem:[#allocation5 + $0x6a8] sm:$0xff] }
  0x89   :  { %2040 = vmatprep.subr.mxu1 %v265_v1  ;;  %2006 = vmatpush3.msra.mxu0 %v217_v2  ;;  %v316_v63 = vld [vmem:[#allocation5 + $0x730] sm:$0xff]  ;;  %v331_v1 = vld [vmem:[#allocation5 + $0x7a8] sm:$0xff] }
  0x8a   :  { %2041 = vmatpush3.msra.mxu1 %v249_v3  ;;  %2007 = vmatprep.subr.mxu0 %v232_v4  ;;  %v283_v2 = vld [vmem:[#allocation5 + $0x628] sm:$0xff]  ;;  %v298_v4 = vld [vmem:[#allocation5 + $0x6a0] sm:$0xff] }
  0x8b   :  { %2042 = vmatprep.subr.mxu1 %v264_v5  ;;  %2008 = vmatpush3.msra.mxu0 %v216_v6  ;;  %v315_v3 = vld [vmem:[#allocation5 + $0x728] sm:$0xff]  ;;  %v330_v5 = vld [vmem:[#allocation5 + $0x7a0] sm:$0xff] }
  0x8c   :  { %2043 = vmatpush3.msra.mxu1 %v248_v7  ;;  %2009 = vmatprep.subr.mxu0 %v231_v10  ;;  %v282_v6 = vld [vmem:[#allocation5 + $0x620] sm:$0xff]  ;;  %v281_v10 = vld [vmem:[#allocation5 + $0x618] sm:$0xff] }
  0x8d   :  { %2044 = vmatprep.subr.mxu1 %v263_v11  ;;  %2010 = vmatpush3.msra.mxu0 %v215_v12  ;;  %v314_v7 = vld [vmem:[#allocation5 + $0x720] sm:$0xff]  ;;  %v313_v11 = vld [vmem:[#allocation5 + $0x718] sm:$0xff]  ;;  %v296_v12 = vld [vmem:[#allocation5 + $0x690] sm:$0xff] }
  0x8e   :  { %2045 = vmatpush3.msra.mxu1 %v247_v13  ;;  %2011 = vmatprep.subr.mxu0 %v230_v16  ;;  %v328_v13 = vld [vmem:[#allocation5 + $0x790] sm:$0xff] }
  0x8f   :  { %2046 = vmatprep.subr.mxu1 %v262_v17  ;;  %2012 = vmatpush3.msra.mxu0 %v214_v19  ;;  %v60_v16 = vld [vmem:[#allocation2 + $0x30] sm:$0xff]  ;;  %v327_v19 = vld [vmem:[#allocation5 + $0x788] sm:$0xff] }
  0x90   :  { %1045 = vmatprep.mubr.f32.mxu0 %v646_v18  ;;  %2047 = vmatpush3.msra.mxu1 %v246_v21  ;;  %v76_v17 = vld [vmem:[#allocation2 + $0xb0] sm:$0xff]  ;;  %v295_v18 = vld [vmem:[#allocation5 + $0x688] sm:$0xff] }
  0x91   :  { %1046 = vmatmul.mubr.f32.vlgmr.msra.gmra.mxu0 %v645_v20  ;;  %1115 = vmatprep.mubr.f32.mxu1 %v648_v22  ;;  %v279_v20 = vld [vmem:[#allocation5 + $0x608] sm:$0xff]  ;;  %v61_v22 = vld [vmem:[#allocation2 + $0x38] sm:$0xff] }
  0x92   :  { %2051 = vmatprep.subr.mxu0 %v309_v24  ;;  %2086 = vmatprep.subr.mxu1 %v341_v25  ;;  %v311_v21 = vld [vmem:[#allocation5 + $0x708] sm:$0xff]  ;;  %v294_v24 = vld [vmem:[#allocation5 + $0x680] sm:$0xff] }
  0x93   :  { %1116 = vmatmul.mubr.f32.vlgmr.msra.gmra.mxu1 %v647_v23  ;;  %2052 = vmatpush3.msra.mxu0 %v293_v26  ;;  %v77_v23 = vld [vmem:[#allocation2 + $0xb8] sm:$0xff]  ;;  %v326_v25 = vld [vmem:[#allocation5 + $0x780] sm:$0xff]  ;;  %v650_v26 = vcombine.high %v60_v16, %v76_v17 }
  0x94   :  { %2087 = vmatpush3.msra.mxu1 %v325_v27  ;;  %2053 = vmatprep.subr.mxu0 %v308_v28  ;;  %v278_v27 = vld [vmem:[#allocation5 + $0x600] sm:$0xff]  ;;  %v649_v28 = vcombine.low %v60_v16, %v76_v17  ;;  %v361_v16 = vld [vmem:[#allocation5 + $0x898] sm:$0xff] }
  0x95   :  { %2088 = vmatprep.subr.mxu1 %v340_v29  ;;  %2054 = vmatpush3.msra.mxu0 %v292_v30  ;;  %v310_v29 = vld [vmem:[#allocation5 + $0x700] sm:$0xff]  ;;  %v652_v30 = vcombine.high %v61_v22, %v77_v23  ;;  %v393_v17 = vld [vmem:[#allocation5 + $0x998] sm:$0xff] }
  0x96   :  { %2089 = vmatpush3.msra.mxu1 %v324_v31  ;;  %2055 = vmatprep.subr.mxu0 %v307_v32  ;;  %v651_v31 = vcombine.low %v61_v22, %v77_v23  ;;  %v373_v32 = vld [vmem:[#allocation5 + $0x8f8] sm:$0xff]  ;;  %v344_v22 = vld [vmem:[#allocation5 + $0x810] sm:$0xff] }
  0x97   :  { %2090 = vmatprep.subr.mxu1 %v339_v33  ;;  %2056 = vmatpush3.msra.mxu0 %v291_v34  ;;  %v405_v33 = vld [vmem:[#allocation5 + $0x9f8] sm:$0xff]  ;;  %v376_v23 = vld [vmem:[#allocation5 + $0x910] sm:$0xff] }
  0x98   :  { %2091 = vmatpush3.msra.mxu1 %v323_v35  ;;  %2057 = vmatprep.subr.mxu0 %v306_v36  ;;  %v357_v34 = vld [vmem:[#allocation5 + $0x878] sm:$0xff]  ;;  %v372_v36 = vld [vmem:[#allocation5 + $0x8f0] sm:$0xff] }
  0x99   :  { %2092 = vmatprep.subr.mxu1 %v338_v37  ;;  %2058 = vmatpush3.msra.mxu0 %v290_v38  ;;  %v389_v35 = vld [vmem:[#allocation5 + $0x978] sm:$0xff]  ;;  %v404_v37 = vld [vmem:[#allocation5 + $0x9f0] sm:$0xff] }
  0x9a   :  { %2093 = vmatpush3.msra.mxu1 %v322_v39  ;;  %2059 = vmatprep.subr.mxu0 %v305_v40  ;;  %v356_v38 = vld [vmem:[#allocation5 + $0x870] sm:$0xff]  ;;  %v371_v40 = vld [vmem:[#allocation5 + $0x8e8] sm:$0xff] }
  0x9b   :  { %2094 = vmatprep.subr.mxu1 %v337_v41  ;;  %2060 = vmatpush3.msra.mxu0 %v289_v42  ;;  %v388_v39 = vld [vmem:[#allocation5 + $0x970] sm:$0xff]  ;;  %v403_v41 = vld [vmem:[#allocation5 + $0x9e8] sm:$0xff] }
  0x9c   :  { %2095 = vmatpush3.msra.mxu1 %v321_v43  ;;  %2061 = vmatprep.subr.mxu0 %v304_v44  ;;  %v355_v42 = vld [vmem:[#allocation5 + $0x868] sm:$0xff]  ;;  %v370_v44 = vld [vmem:[#allocation5 + $0x8e0] sm:$0xff] }
  0x9d   :  { %2096 = vmatprep.subr.mxu1 %v336_v45  ;;  %2062 = vmatpush3.msra.mxu0 %v288_v46  ;;  %v387_v43 = vld [vmem:[#allocation5 + $0x968] sm:$0xff]  ;;  %v402_v45 = vld [vmem:[#allocation5 + $0x9e0] sm:$0xff] }
  0x9e   :  { %2097 = vmatpush3.msra.mxu1 %v320_v47  ;;  %2063 = vmatprep.subr.mxu0 %v303_v48  ;;  %v354_v46 = vld [vmem:[#allocation5 + $0x860] sm:$0xff]  ;;  %v369_v48 = vld [vmem:[#allocation5 + $0x8d8] sm:$0xff] }
  0x9f   :  { %2098 = vmatprep.subr.mxu1 %v335_v49  ;;  %2064 = vmatpush3.msra.mxu0 %v287_v50  ;;  %v386_v47 = vld [vmem:[#allocation5 + $0x960] sm:$0xff]  ;;  %v401_v49 = vld [vmem:[#allocation5 + $0x9d8] sm:$0xff] }
  0xa0   :  { %2099 = vmatpush3.msra.mxu1 %v319_v51  ;;  %2065 = vmatprep.subr.mxu0 %v302_v52  ;;  %v353_v50 = vld [vmem:[#allocation5 + $0x858] sm:$0xff]  ;;  %v368_v52 = vld [vmem:[#allocation5 + $0x8d0] sm:$0xff] }
  0xa1   :  { %2100 = vmatprep.subr.mxu1 %v334_v53  ;;  %2066 = vmatpush3.msra.mxu0 %v286_v54  ;;  %v385_v51 = vld [vmem:[#allocation5 + $0x958] sm:$0xff]  ;;  %v400_v53 = vld [vmem:[#allocation5 + $0x9d0] sm:$0xff] }
  0xa2   :  { %2101 = vmatpush3.msra.mxu1 %v318_v55  ;;  %2067 = vmatprep.subr.mxu0 %v301_v56  ;;  %v352_v54 = vld [vmem:[#allocation5 + $0x850] sm:$0xff]  ;;  %v367_v56 = vld [vmem:[#allocation5 + $0x8c8] sm:$0xff] }
  0xa3   :  { %2102 = vmatprep.subr.mxu1 %v333_v57  ;;  %2068 = vmatpush3.msra.mxu0 %v285_v58  ;;  %v384_v55 = vld [vmem:[#allocation5 + $0x950] sm:$0xff]  ;;  %v399_v57 = vld [vmem:[#allocation5 + $0x9c8] sm:$0xff] }
  0xa4   :  { %2103 = vmatpush3.msra.mxu1 %v317_v59  ;;  %2069 = vmatprep.subr.mxu0 %v300_v60  ;;  %v351_v58 = vld [vmem:[#allocation5 + $0x848] sm:$0xff]  ;;  %v366_v60 = vld [vmem:[#allocation5 + $0x8c0] sm:$0xff] }
  0xa5   :  { %2104 = vmatprep.subr.mxu1 %v332_v61  ;;  %2070 = vmatpush3.msra.mxu0 %v284_v62  ;;  %v383_v59 = vld [vmem:[#allocation5 + $0x948] sm:$0xff]  ;;  %v398_v61 = vld [vmem:[#allocation5 + $0x9c0] sm:$0xff] }
  0xa6   :  { %2105 = vmatpush3.msra.mxu1 %v316_v63  ;;  %2071 = vmatprep.subr.mxu0 %v299_v0  ;;  %v350_v62 = vld [vmem:[#allocation5 + $0x840] sm:$0xff]  ;;  %v365_v0 = vld [vmem:[#allocation5 + $0x8b8] sm:$0xff] }
  0xa7   :  { %2106 = vmatprep.subr.mxu1 %v331_v1  ;;  %2072 = vmatpush3.msra.mxu0 %v283_v2  ;;  %v382_v63 = vld [vmem:[#allocation5 + $0x940] sm:$0xff]  ;;  %v397_v1 = vld [vmem:[#allocation5 + $0x9b8] sm:$0xff] }
  0xa8   :  { %2107 = vmatpush3.msra.mxu1 %v315_v3  ;;  %2073 = vmatprep.subr.mxu0 %v298_v4  ;;  %v349_v2 = vld [vmem:[#allocation5 + $0x838] sm:$0xff]  ;;  %v364_v4 = vld [vmem:[#allocation5 + $0x8b0] sm:$0xff] }
  0xa9   :  { %2108 = vmatprep.subr.mxu1 %v330_v5  ;;  %2074 = vmatpush3.msra.mxu0 %v282_v6  ;;  %v381_v3 = vld [vmem:[#allocation5 + $0x938] sm:$0xff]  ;;  %v396_v5 = vld [vmem:[#allocation5 + $0x9b0] sm:$0xff] }
  0xaa   :  { %2109 = vmatpush3.msra.mxu1 %v314_v7  ;;  %2075 = vmatprep.subr.mxu0 %v297_v8  ;;  %v348_v6 = vld [vmem:[#allocation5 + $0x830] sm:$0xff]  ;;  %v363_v8 = vld [vmem:[#allocation5 + $0x8a8] sm:$0xff] }
  0xab   :  { %2110 = vmatprep.subr.mxu1 %v329_v9  ;;  %2076 = vmatpush3.msra.mxu0 %v281_v10  ;;  %v380_v7 = vld [vmem:[#allocation5 + $0x930] sm:$0xff]  ;;  %v395_v9 = vld [vmem:[#allocation5 + $0x9a8] sm:$0xff] }
  0xac   :  { %2111 = vmatpush3.msra.mxu1 %v313_v11  ;;  %2077 = vmatprep.subr.mxu0 %v296_v12  ;;  %v347_v10 = vld [vmem:[#allocation5 + $0x828] sm:$0xff]  ;;  %v362_v12 = vld [vmem:[#allocation5 + $0x8a0] sm:$0xff] }
  0xad   :  { %2112 = vmatprep.subr.mxu1 %v328_v13  ;;  %2078 = vmatpush3.msra.mxu0 %v280_v14  ;;  %v379_v11 = vld [vmem:[#allocation5 + $0x928] sm:$0xff]  ;;  %v394_v13 = vld [vmem:[#allocation5 + $0x9a0] sm:$0xff] }
  0xae   :  { %2113 = vmatpush3.msra.mxu1 %v312_v15  ;;  %2079 = vmatprep.subr.mxu0 %v295_v18  ;;  %v346_v14 = vld [vmem:[#allocation5 + $0x820] sm:$0xff]  ;;  %v345_v18 = vld [vmem:[#allocation5 + $0x818] sm:$0xff] }
  0xaf   :  { %2114 = vmatprep.subr.mxu1 %v327_v19  ;;  %2080 = vmatpush3.msra.mxu0 %v279_v20  ;;  %v378_v15 = vld [vmem:[#allocation5 + $0x920] sm:$0xff]  ;;  %v377_v19 = vld [vmem:[#allocation5 + $0x918] sm:$0xff]  ;;  %v360_v20 = vld [vmem:[#allocation5 + $0x890] sm:$0xff] }
  0xb0   :  { %2115 = vmatpush3.msra.mxu1 %v311_v21  ;;  %2081 = vmatprep.subr.mxu0 %v294_v24  ;;  %v392_v21 = vld [vmem:[#allocation5 + $0x990] sm:$0xff]  ;;  %v62_v24 = vld [vmem:[#allocation2 + $0x40] sm:$0xff] }
  0xb1   :  { %2116 = vmatprep.subr.mxu1 %v326_v25  ;;  %2082 = vmatpush3.msra.mxu0 %v278_v27  ;;  %v78_v25 = vld [vmem:[#allocation2 + $0xc0] sm:$0xff]  ;;  %v391_v27 = vld [vmem:[#allocation5 + $0x988] sm:$0xff] }
  0xb2   :  { %1185 = vmatprep.mubr.f32.mxu0 %v650_v26  ;;  %2117 = vmatpush3.msra.mxu1 %v310_v29  ;;  %v359_v26 = vld [vmem:[#allocation5 + $0x888] sm:$0xff] }
  0xb3   :  { %1186 = vmatmul.mubr.f32.vlgmr.msra.gmra.mxu0 %v649_v28  ;;  %1255 = vmatprep.mubr.f32.mxu1 %v652_v30  ;;  %v343_v28 = vld [vmem:[#allocation5 + $0x808] sm:$0xff] }
  0xb4   :  { %2121 = vmatprep.subr.mxu0 %v373_v32  ;;  %2156 = vmatprep.subr.mxu1 %v405_v33  ;;  %v375_v29 = vld [vmem:[#allocation5 + $0x908] sm:$0xff]  ;;  %v358_v32 = vld [vmem:[#allocation5 + $0x880] sm:$0xff] }
  0xb5   :  { %1256 = vmatmul.mubr.f32.vlgmr.msra.gmra.mxu1 %v651_v31  ;;  %2122 = vmatpush3.msra.mxu0 %v357_v34  ;;  %v63_v30 = vld [vmem:[#allocation2 + $0x48] sm:$0xff]  ;;  %v390_v33 = vld [vmem:[#allocation5 + $0x980] sm:$0xff]  ;;  %v654_v34 = vcombine.high %v62_v24, %v78_v25 }
  0xb6   :  { %2157 = vmatpush3.msra.mxu1 %v389_v35  ;;  %2123 = vmatprep.subr.mxu0 %v372_v36  ;;  %v79_v31 = vld [vmem:[#allocation2 + $0xc8] sm:$0xff]  ;;  %v342_v35 = vld [vmem:[#allocation5 + $0x800] sm:$0xff]  ;;  %v653_v36 = vcombine.low %v62_v24, %v78_v25  ;;  %v425_v24 = vld [vmem:[#allocation5 + $0xa98] sm:$0xff] }
  0xb7   :  { %2158 = vmatprep.subr.mxu1 %v404_v37  ;;  %2124 = vmatpush3.msra.mxu0 %v356_v38  ;;  %v374_v37 = vld [vmem:[#allocation5 + $0x900] sm:$0xff]  ;;  %v656_v38 = vcombine.high %v63_v30, %v79_v31  ;;  %v457_v25 = vld [vmem:[#allocation5 + $0xb98] sm:$0xff] }
  0xb8   :  { %2159 = vmatpush3.msra.mxu1 %v388_v39  ;;  %2125 = vmatprep.subr.mxu0 %v371_v40  ;;  %v655_v39 = vcombine.low %v63_v30, %v79_v31  ;;  %v437_v40 = vld [vmem:[#allocation5 + $0xaf8] sm:$0xff]  ;;  %v408_v30 = vld [vmem:[#allocation5 + $0xa10] sm:$0xff] }
  0xb9   :  { %2160 = vmatprep.subr.mxu1 %v403_v41  ;;  %2126 = vmatpush3.msra.mxu0 %v355_v42  ;;  %v469_v41 = vld [vmem:[#allocation5 + $0xbf8] sm:$0xff]  ;;  %v440_v31 = vld [vmem:[#allocation5 + $0xb10] sm:$0xff] }
  0xba   :  { %2161 = vmatpush3.msra.mxu1 %v387_v43  ;;  %2127 = vmatprep.subr.mxu0 %v370_v44  ;;  %v421_v42 = vld [vmem:[#allocation5 + $0xa78] sm:$0xff]  ;;  %v436_v44 = vld [vmem:[#allocation5 + $0xaf0] sm:$0xff] }
  0xbb   :  { %2162 = vmatprep.subr.mxu1 %v402_v45  ;;  %2128 = vmatpush3.msra.mxu0 %v354_v46  ;;  %v453_v43 = vld [vmem:[#allocation5 + $0xb78] sm:$0xff]  ;;  %v468_v45 = vld [vmem:[#allocation5 + $0xbf0] sm:$0xff] }
  0xbc   :  { %2163 = vmatpush3.msra.mxu1 %v386_v47  ;;  %2129 = vmatprep.subr.mxu0 %v369_v48  ;;  %v420_v46 = vld [vmem:[#allocation5 + $0xa70] sm:$0xff]  ;;  %v435_v48 = vld [vmem:[#allocation5 + $0xae8] sm:$0xff] }
  0xbd   :  { %2164 = vmatprep.subr.mxu1 %v401_v49  ;;  %2130 = vmatpush3.msra.mxu0 %v353_v50  ;;  %v452_v47 = vld [vmem:[#allocation5 + $0xb70] sm:$0xff]  ;;  %v467_v49 = vld [vmem:[#allocation5 + $0xbe8] sm:$0xff] }
  0xbe   :  { %2165 = vmatpush3.msra.mxu1 %v385_v51  ;;  %2131 = vmatprep.subr.mxu0 %v368_v52  ;;  %v419_v50 = vld [vmem:[#allocation5 + $0xa68] sm:$0xff]  ;;  %v434_v52 = vld [vmem:[#allocation5 + $0xae0] sm:$0xff] }
  0xbf   :  { %2166 = vmatprep.subr.mxu1 %v400_v53  ;;  %2132 = vmatpush3.msra.mxu0 %v352_v54  ;;  %v451_v51 = vld [vmem:[#allocation5 + $0xb68] sm:$0xff]  ;;  %v466_v53 = vld [vmem:[#allocation5 + $0xbe0] sm:$0xff] }
  0xc0   :  { %2167 = vmatpush3.msra.mxu1 %v384_v55  ;;  %2133 = vmatprep.subr.mxu0 %v367_v56  ;;  %v418_v54 = vld [vmem:[#allocation5 + $0xa60] sm:$0xff]  ;;  %v433_v56 = vld [vmem:[#allocation5 + $0xad8] sm:$0xff] }
  0xc1   :  { %2168 = vmatprep.subr.mxu1 %v399_v57  ;;  %2134 = vmatpush3.msra.mxu0 %v351_v58  ;;  %v450_v55 = vld [vmem:[#allocation5 + $0xb60] sm:$0xff]  ;;  %v465_v57 = vld [vmem:[#allocation5 + $0xbd8] sm:$0xff] }
  0xc2   :  { %2169 = vmatpush3.msra.mxu1 %v383_v59  ;;  %2135 = vmatprep.subr.mxu0 %v366_v60  ;;  %v417_v58 = vld [vmem:[#allocation5 + $0xa58] sm:$0xff]  ;;  %v432_v60 = vld [vmem:[#allocation5 + $0xad0] sm:$0xff] }
  0xc3   :  { %2170 = vmatprep.subr.mxu1 %v398_v61  ;;  %2136 = vmatpush3.msra.mxu0 %v350_v62  ;;  %v449_v59 = vld [vmem:[#allocation5 + $0xb58] sm:$0xff]  ;;  %v464_v61 = vld [vmem:[#allocation5 + $0xbd0] sm:$0xff] }
  0xc4   :  { %2171 = vmatpush3.msra.mxu1 %v382_v63  ;;  %2137 = vmatprep.subr.mxu0 %v365_v0  ;;  %v416_v62 = vld [vmem:[#allocation5 + $0xa50] sm:$0xff]  ;;  %v431_v0 = vld [vmem:[#allocation5 + $0xac8] sm:$0xff] }
  0xc5   :  { %2172 = vmatprep.subr.mxu1 %v397_v1  ;;  %2138 = vmatpush3.msra.mxu0 %v349_v2  ;;  %v448_v63 = vld [vmem:[#allocation5 + $0xb50] sm:$0xff]  ;;  %v463_v1 = vld [vmem:[#allocation5 + $0xbc8] sm:$0xff] }
  0xc6   :  { %2173 = vmatpush3.msra.mxu1 %v381_v3  ;;  %2139 = vmatprep.subr.mxu0 %v364_v4  ;;  %v415_v2 = vld [vmem:[#allocation5 + $0xa48] sm:$0xff]  ;;  %v430_v4 = vld [vmem:[#allocation5 + $0xac0] sm:$0xff] }
  0xc7   :  { %2174 = vmatprep.subr.mxu1 %v396_v5  ;;  %2140 = vmatpush3.msra.mxu0 %v348_v6  ;;  %v447_v3 = vld [vmem:[#allocation5 + $0xb48] sm:$0xff]  ;;  %v462_v5 = vld [vmem:[#allocation5 + $0xbc0] sm:$0xff] }
  0xc8   :  { %2175 = vmatpush3.msra.mxu1 %v380_v7  ;;  %2141 = vmatprep.subr.mxu0 %v363_v8  ;;  %v414_v6 = vld [vmem:[#allocation5 + $0xa40] sm:$0xff]  ;;  %v429_v8 = vld [vmem:[#allocation5 + $0xab8] sm:$0xff] }
  0xc9   :  { %2176 = vmatprep.subr.mxu1 %v395_v9  ;;  %2142 = vmatpush3.msra.mxu0 %v347_v10  ;;  %v446_v7 = vld [vmem:[#allocation5 + $0xb40] sm:$0xff]  ;;  %v461_v9 = vld [vmem:[#allocation5 + $0xbb8] sm:$0xff] }
  0xca   :  { %2177 = vmatpush3.msra.mxu1 %v379_v11  ;;  %2143 = vmatprep.subr.mxu0 %v362_v12  ;;  %v413_v10 = vld [vmem:[#allocation5 + $0xa38] sm:$0xff]  ;;  %v428_v12 = vld [vmem:[#allocation5 + $0xab0] sm:$0xff] }
  0xcb   :  { %2178 = vmatprep.subr.mxu1 %v394_v13  ;;  %2144 = vmatpush3.msra.mxu0 %v346_v14  ;;  %v445_v11 = vld [vmem:[#allocation5 + $0xb38] sm:$0xff]  ;;  %v460_v13 = vld [vmem:[#allocation5 + $0xbb0] sm:$0xff] }
  0xcc   :  { %2179 = vmatpush3.msra.mxu1 %v378_v15  ;;  %2145 = vmatprep.subr.mxu0 %v361_v16  ;;  %v412_v14 = vld [vmem:[#allocation5 + $0xa30] sm:$0xff]  ;;  %v427_v16 = vld [vmem:[#allocation5 + $0xaa8] sm:$0xff] }
  0xcd   :  { %2180 = vmatprep.subr.mxu1 %v393_v17  ;;  %2146 = vmatpush3.msra.mxu0 %v345_v18  ;;  %v444_v15 = vld [vmem:[#allocation5 + $0xb30] sm:$0xff]  ;;  %v459_v17 = vld [vmem:[#allocation5 + $0xba8] sm:$0xff] }
  0xce   :  { %2181 = vmatpush3.msra.mxu1 %v377_v19  ;;  %2147 = vmatprep.subr.mxu0 %v360_v20  ;;  %v411_v18 = vld [vmem:[#allocation5 + $0xa28] sm:$0xff]  ;;  %v426_v20 = vld [vmem:[#allocation5 + $0xaa0] sm:$0xff] }
  0xcf   :  { %2182 = vmatprep.subr.mxu1 %v392_v21  ;;  %2148 = vmatpush3.msra.mxu0 %v344_v22  ;;  %v443_v19 = vld [vmem:[#allocation5 + $0xb28] sm:$0xff]  ;;  %v458_v21 = vld [vmem:[#allocation5 + $0xba0] sm:$0xff] }
  0xd0   :  { %2183 = vmatpush3.msra.mxu1 %v376_v23  ;;  %2149 = vmatprep.subr.mxu0 %v359_v26  ;;  %v410_v22 = vld [vmem:[#allocation5 + $0xa20] sm:$0xff]  ;;  %v409_v26 = vld [vmem:[#allocation5 + $0xa18] sm:$0xff] }
  0xd1   :  { %2184 = vmatprep.subr.mxu1 %v391_v27  ;;  %2150 = vmatpush3.msra.mxu0 %v343_v28  ;;  %v442_v23 = vld [vmem:[#allocation5 + $0xb20] sm:$0xff]  ;;  %v441_v27 = vld [vmem:[#allocation5 + $0xb18] sm:$0xff]  ;;  %v424_v28 = vld [vmem:[#allocation5 + $0xa90] sm:$0xff] }
  0xd2   :  { %2185 = vmatpush3.msra.mxu1 %v375_v29  ;;  %2151 = vmatprep.subr.mxu0 %v358_v32  ;;  %v456_v29 = vld [vmem:[#allocation5 + $0xb90] sm:$0xff] }
  0xd3   :  { %2186 = vmatprep.subr.mxu1 %v390_v33  ;;  %2152 = vmatpush3.msra.mxu0 %v342_v35  ;;  %v64_v32 = vld [vmem:[#allocation2 + $0x50] sm:$0xff]  ;;  %v455_v35 = vld [vmem:[#allocation5 + $0xb88] sm:$0xff] }
  0xd4   :  { %1325 = vmatprep.mubr.f32.mxu0 %v654_v34  ;;  %2187 = vmatpush3.msra.mxu1 %v374_v37  ;;  %v80_v33 = vld [vmem:[#allocation2 + $0xd0] sm:$0xff]  ;;  %v423_v34 = vld [vmem:[#allocation5 + $0xa88] sm:$0xff] }
  0xd5   :  { %1326 = vmatmul.mubr.f32.vlgmr.msra.gmra.mxu0 %v653_v36  ;;  %1395 = vmatprep.mubr.f32.mxu1 %v656_v38  ;;  %v407_v36 = vld [vmem:[#allocation5 + $0xa08] sm:$0xff]  ;;  %v65_v38 = vld [vmem:[#allocation2 + $0x58] sm:$0xff] }
  0xd6   :  { %2191 = vmatprep.subr.mxu0 %v437_v40  ;;  %2226 = vmatprep.subr.mxu1 %v469_v41  ;;  %v439_v37 = vld [vmem:[#allocation5 + $0xb08] sm:$0xff]  ;;  %v422_v40 = vld [vmem:[#allocation5 + $0xa80] sm:$0xff] }
  0xd7   :  { %1396 = vmatmul.mubr.f32.vlgmr.msra.gmra.mxu1 %v655_v39  ;;  %2192 = vmatpush3.msra.mxu0 %v421_v42  ;;  %v81_v39 = vld [vmem:[#allocation2 + $0xd8] sm:$0xff]  ;;  %v454_v41 = vld [vmem:[#allocation5 + $0xb80] sm:$0xff]  ;;  %v658_v42 = vcombine.high %v64_v32, %v80_v33 }
  0xd8   :  { %2227 = vmatpush3.msra.mxu1 %v453_v43  ;;  %2193 = vmatprep.subr.mxu0 %v436_v44  ;;  %v406_v43 = vld [vmem:[#allocation5 + $0xa00] sm:$0xff]  ;;  %v657_v44 = vcombine.low %v64_v32, %v80_v33  ;;  %v489_v32 = vld [vmem:[#allocation5 + $0xc98] sm:$0xff] }
  0xd9   :  { %2228 = vmatprep.subr.mxu1 %v468_v45  ;;  %2194 = vmatpush3.msra.mxu0 %v420_v46  ;;  %v438_v45 = vld [vmem:[#allocation5 + $0xb00] sm:$0xff]  ;;  %v660_v46 = vcombine.high %v65_v38, %v81_v39  ;;  %v521_v33 = vld [vmem:[#allocation5 + $0xd98] sm:$0xff] }
  0xda   :  { %2229 = vmatpush3.msra.mxu1 %v452_v47  ;;  %2195 = vmatprep.subr.mxu0 %v435_v48  ;;  %v659_v47 = vcombine.low %v65_v38, %v81_v39  ;;  %v501_v48 = vld [vmem:[#allocation5 + $0xcf8] sm:$0xff]  ;;  %v472_v38 = vld [vmem:[#allocation5 + $0xc10] sm:$0xff] }
  0xdb   :  { %2230 = vmatprep.subr.mxu1 %v467_v49  ;;  %2196 = vmatpush3.msra.mxu0 %v419_v50  ;;  %v533_v49 = vld [vmem:[#allocation5 + $0xdf8] sm:$0xff]  ;;  %v504_v39 = vld [vmem:[#allocation5 + $0xd10] sm:$0xff] }
  0xdc   :  { %2231 = vmatpush3.msra.mxu1 %v451_v51  ;;  %2197 = vmatprep.subr.mxu0 %v434_v52  ;;  %v485_v50 = vld [vmem:[#allocation5 + $0xc78] sm:$0xff]  ;;  %v500_v52 = vld [vmem:[#allocation5 + $0xcf0] sm:$0xff] }
  0xdd   :  { %2232 = vmatprep.subr.mxu1 %v466_v53  ;;  %2198 = vmatpush3.msra.mxu0 %v418_v54  ;;  %v517_v51 = vld [vmem:[#allocation5 + $0xd78] sm:$0xff]  ;;  %v532_v53 = vld [vmem:[#allocation5 + $0xdf0] sm:$0xff] }
  0xde   :  { %2233 = vmatpush3.msra.mxu1 %v450_v55  ;;  %2199 = vmatprep.subr.mxu0 %v433_v56  ;;  %v484_v54 = vld [vmem:[#allocation5 + $0xc70] sm:$0xff]  ;;  %v499_v56 = vld [vmem:[#allocation5 + $0xce8] sm:$0xff] }
  0xdf   :  { %2234 = vmatprep.subr.mxu1 %v465_v57  ;;  %2200 = vmatpush3.msra.mxu0 %v417_v58  ;;  %v516_v55 = vld [vmem:[#allocation5 + $0xd70] sm:$0xff]  ;;  %v531_v57 = vld [vmem:[#allocation5 + $0xde8] sm:$0xff] }
  0xe0   :  { %2235 = vmatpush3.msra.mxu1 %v449_v59  ;;  %2201 = vmatprep.subr.mxu0 %v432_v60  ;;  %v483_v58 = vld [vmem:[#allocation5 + $0xc68] sm:$0xff]  ;;  %v498_v60 = vld [vmem:[#allocation5 + $0xce0] sm:$0xff] }
  0xe1   :  { %2236 = vmatprep.subr.mxu1 %v464_v61  ;;  %2202 = vmatpush3.msra.mxu0 %v416_v62  ;;  %v515_v59 = vld [vmem:[#allocation5 + $0xd68] sm:$0xff]  ;;  %v530_v61 = vld [vmem:[#allocation5 + $0xde0] sm:$0xff] }
  0xe2   :  { %2237 = vmatpush3.msra.mxu1 %v448_v63  ;;  %2203 = vmatprep.subr.mxu0 %v431_v0  ;;  %v482_v62 = vld [vmem:[#allocation5 + $0xc60] sm:$0xff]  ;;  %v497_v0 = vld [vmem:[#allocation5 + $0xcd8] sm:$0xff] }
  0xe3   :  { %2238 = vmatprep.subr.mxu1 %v463_v1  ;;  %2204 = vmatpush3.msra.mxu0 %v415_v2  ;;  %v514_v63 = vld [vmem:[#allocation5 + $0xd60] sm:$0xff]  ;;  %v529_v1 = vld [vmem:[#allocation5 + $0xdd8] sm:$0xff] }
  0xe4   :  { %2239 = vmatpush3.msra.mxu1 %v447_v3  ;;  %2205 = vmatprep.subr.mxu0 %v430_v4  ;;  %v481_v2 = vld [vmem:[#allocation5 + $0xc58] sm:$0xff]  ;;  %v496_v4 = vld [vmem:[#allocation5 + $0xcd0] sm:$0xff] }
  0xe5   :  { %2240 = vmatprep.subr.mxu1 %v462_v5  ;;  %2206 = vmatpush3.msra.mxu0 %v414_v6  ;;  %v513_v3 = vld [vmem:[#allocation5 + $0xd58] sm:$0xff]  ;;  %v528_v5 = vld [vmem:[#allocation5 + $0xdd0] sm:$0xff] }
  0xe6   :  { %2241 = vmatpush3.msra.mxu1 %v446_v7  ;;  %2207 = vmatprep.subr.mxu0 %v429_v8  ;;  %v480_v6 = vld [vmem:[#allocation5 + $0xc50] sm:$0xff]  ;;  %v495_v8 = vld [vmem:[#allocation5 + $0xcc8] sm:$0xff] }
  0xe7   :  { %2242 = vmatprep.subr.mxu1 %v461_v9  ;;  %2208 = vmatpush3.msra.mxu0 %v413_v10  ;;  %v512_v7 = vld [vmem:[#allocation5 + $0xd50] sm:$0xff]  ;;  %v527_v9 = vld [vmem:[#allocation5 + $0xdc8] sm:$0xff] }
  0xe8   :  { %2243 = vmatpush3.msra.mxu1 %v445_v11  ;;  %2209 = vmatprep.subr.mxu0 %v428_v12  ;;  %v479_v10 = vld [vmem:[#allocation5 + $0xc48] sm:$0xff]  ;;  %v494_v12 = vld [vmem:[#allocation5 + $0xcc0] sm:$0xff] }
  0xe9   :  { %2244 = vmatprep.subr.mxu1 %v460_v13  ;;  %2210 = vmatpush3.msra.mxu0 %v412_v14  ;;  %v511_v11 = vld [vmem:[#allocation5 + $0xd48] sm:$0xff]  ;;  %v526_v13 = vld [vmem:[#allocation5 + $0xdc0] sm:$0xff] }
  0xea   :  { %2245 = vmatpush3.msra.mxu1 %v444_v15  ;;  %2211 = vmatprep.subr.mxu0 %v427_v16  ;;  %v478_v14 = vld [vmem:[#allocation5 + $0xc40] sm:$0xff]  ;;  %v493_v16 = vld [vmem:[#allocation5 + $0xcb8] sm:$0xff] }
  0xeb   :  { %2246 = vmatprep.subr.mxu1 %v459_v17  ;;  %2212 = vmatpush3.msra.mxu0 %v411_v18  ;;  %v510_v15 = vld [vmem:[#allocation5 + $0xd40] sm:$0xff]  ;;  %v525_v17 = vld [vmem:[#allocation5 + $0xdb8] sm:$0xff] }
  0xec   :  { %2247 = vmatpush3.msra.mxu1 %v443_v19  ;;  %2213 = vmatprep.subr.mxu0 %v426_v20  ;;  %v477_v18 = vld [vmem:[#allocation5 + $0xc38] sm:$0xff]  ;;  %v492_v20 = vld [vmem:[#allocation5 + $0xcb0] sm:$0xff] }
  0xed   :  { %2248 = vmatprep.subr.mxu1 %v458_v21  ;;  %2214 = vmatpush3.msra.mxu0 %v410_v22  ;;  %v509_v19 = vld [vmem:[#allocation5 + $0xd38] sm:$0xff]  ;;  %v524_v21 = vld [vmem:[#allocation5 + $0xdb0] sm:$0xff] }
  0xee   :  { %2249 = vmatpush3.msra.mxu1 %v442_v23  ;;  %2215 = vmatprep.subr.mxu0 %v425_v24  ;;  %v476_v22 = vld [vmem:[#allocation5 + $0xc30] sm:$0xff]  ;;  %v491_v24 = vld [vmem:[#allocation5 + $0xca8] sm:$0xff] }
  0xef   :  { %2250 = vmatprep.subr.mxu1 %v457_v25  ;;  %2216 = vmatpush3.msra.mxu0 %v409_v26  ;;  %v508_v23 = vld [vmem:[#allocation5 + $0xd30] sm:$0xff]  ;;  %v523_v25 = vld [vmem:[#allocation5 + $0xda8] sm:$0xff] }
  0xf0   :  { %2251 = vmatpush3.msra.mxu1 %v441_v27  ;;  %2217 = vmatprep.subr.mxu0 %v424_v28  ;;  %v475_v26 = vld [vmem:[#allocation5 + $0xc28] sm:$0xff]  ;;  %v490_v28 = vld [vmem:[#allocation5 + $0xca0] sm:$0xff] }
  0xf1   :  { %2252 = vmatprep.subr.mxu1 %v456_v29  ;;  %2218 = vmatpush3.msra.mxu0 %v408_v30  ;;  %v507_v27 = vld [vmem:[#allocation5 + $0xd28] sm:$0xff]  ;;  %v522_v29 = vld [vmem:[#allocation5 + $0xda0] sm:$0xff] }
  0xf2   :  { %2253 = vmatpush3.msra.mxu1 %v440_v31  ;;  %2219 = vmatprep.subr.mxu0 %v423_v34  ;;  %v474_v30 = vld [vmem:[#allocation5 + $0xc20] sm:$0xff]  ;;  %v473_v34 = vld [vmem:[#allocation5 + $0xc18] sm:$0xff] }
  0xf3   :  { %2254 = vmatprep.subr.mxu1 %v455_v35  ;;  %2220 = vmatpush3.msra.mxu0 %v407_v36  ;;  %v506_v31 = vld [vmem:[#allocation5 + $0xd20] sm:$0xff]  ;;  %v505_v35 = vld [vmem:[#allocation5 + $0xd18] sm:$0xff]  ;;  %v488_v36 = vld [vmem:[#allocation5 + $0xc90] sm:$0xff] }
  0xf4   :  { %2255 = vmatpush3.msra.mxu1 %v439_v37  ;;  %2221 = vmatprep.subr.mxu0 %v422_v40  ;;  %v520_v37 = vld [vmem:[#allocation5 + $0xd90] sm:$0xff]  ;;  %v66_v40 = vld [vmem:[#allocation2 + $0x60] sm:$0xff] }
  0xf5   :  { %2256 = vmatprep.subr.mxu1 %v454_v41  ;;  %2222 = vmatpush3.msra.mxu0 %v406_v43  ;;  %v82_v41 = vld [vmem:[#allocation2 + $0xe0] sm:$0xff]  ;;  %v519_v43 = vld [vmem:[#allocation5 + $0xd88] sm:$0xff] }
  0xf6   :  { %1465 = vmatprep.mubr.f32.mxu0 %v658_v42  ;;  %2257 = vmatpush3.msra.mxu1 %v438_v45  ;;  %v487_v42 = vld [vmem:[#allocation5 + $0xc88] sm:$0xff] }
  0xf7   :  { %1466 = vmatmul.mubr.f32.vlgmr.msra.gmra.mxu0 %v657_v44  ;;  %1535 = vmatprep.mubr.f32.mxu1 %v660_v46  ;;  %v471_v44 = vld [vmem:[#allocation5 + $0xc08] sm:$0xff] }
  0xf8   :  { %2261 = vmatprep.subr.mxu0 %v501_v48  ;;  %2296 = vmatprep.subr.mxu1 %v533_v49  ;;  %v503_v45 = vld [vmem:[#allocation5 + $0xd08] sm:$0xff]  ;;  %v486_v48 = vld [vmem:[#allocation5 + $0xc80] sm:$0xff] }
  0xf9   :  { %1536 = vmatmul.mubr.f32.vlgmr.msra.gmra.mxu1 %v659_v47  ;;  %2262 = vmatpush3.msra.mxu0 %v485_v50  ;;  %v67_v46 = vld [vmem:[#allocation2 + $0x68] sm:$0xff]  ;;  %v518_v49 = vld [vmem:[#allocation5 + $0xd80] sm:$0xff]  ;;  %v662_v50 = vcombine.high %v66_v40, %v82_v41 }
  0xfa   :  { %2297 = vmatpush3.msra.mxu1 %v517_v51  ;;  %2263 = vmatprep.subr.mxu0 %v500_v52  ;;  %v83_v47 = vld [vmem:[#allocation2 + $0xe8] sm:$0xff]  ;;  %v470_v51 = vld [vmem:[#allocation5 + $0xc00] sm:$0xff]  ;;  %v661_v52 = vcombine.low %v66_v40, %v82_v41  ;;  %v553_v40 = vld [vmem:[#allocation5 + $0xe98] sm:$0xff] }
  0xfb   :  { %2298 = vmatprep.subr.mxu1 %v532_v53  ;;  %2264 = vmatpush3.msra.mxu0 %v484_v54  ;;  %v502_v53 = vld [vmem:[#allocation5 + $0xd00] sm:$0xff]  ;;  %v664_v54 = vcombine.high %v67_v46, %v83_v47  ;;  %v585_v41 = vld [vmem:[#allocation5 + $0xf98] sm:$0xff] }
  0xfc   :  { %2299 = vmatpush3.msra.mxu1 %v516_v55  ;;  %2265 = vmatprep.subr.mxu0 %v499_v56  ;;  %v663_v55 = vcombine.low %v67_v46, %v83_v47  ;;  %v565_v56 = vld [vmem:[#allocation5 + $0xef8] sm:$0xff]  ;;  %v536_v46 = vld [vmem:[#allocation5 + $0xe10] sm:$0xff] }
  0xfd   :  { %2300 = vmatprep.subr.mxu1 %v531_v57  ;;  %2266 = vmatpush3.msra.mxu0 %v483_v58  ;;  %v597_v57 = vld [vmem:[#allocation5 + $0xff8] sm:$0xff]  ;;  %v568_v47 = vld [vmem:[#allocation5 + $0xf10] sm:$0xff] }
  0xfe   :  { %2301 = vmatpush3.msra.mxu1 %v515_v59  ;;  %2267 = vmatprep.subr.mxu0 %v498_v60  ;;  %v549_v58 = vld [vmem:[#allocation5 + $0xe78] sm:$0xff]  ;;  %v564_v60 = vld [vmem:[#allocation5 + $0xef0] sm:$0xff] }
  0xff   :  { %2302 = vmatprep.subr.mxu1 %v530_v61  ;;  %2268 = vmatpush3.msra.mxu0 %v482_v62  ;;  %v581_v59 = vld [vmem:[#allocation5 + $0xf78] sm:$0xff]  ;;  %v596_v61 = vld [vmem:[#allocation5 + $0xff0] sm:$0xff] }
 0x100   :  { %2303 = vmatpush3.msra.mxu1 %v514_v63  ;;  %2269 = vmatprep.subr.mxu0 %v497_v0  ;;  %v548_v62 = vld [vmem:[#allocation5 + $0xe70] sm:$0xff]  ;;  %v563_v0 = vld [vmem:[#allocation5 + $0xee8] sm:$0xff] }
 0x101   :  { %2304 = vmatprep.subr.mxu1 %v529_v1  ;;  %2270 = vmatpush3.msra.mxu0 %v481_v2  ;;  %v580_v63 = vld [vmem:[#allocation5 + $0xf70] sm:$0xff]  ;;  %v595_v1 = vld [vmem:[#allocation5 + $0xfe8] sm:$0xff] }
 0x102   :  { %2305 = vmatpush3.msra.mxu1 %v513_v3  ;;  %2271 = vmatprep.subr.mxu0 %v496_v4  ;;  %v547_v2 = vld [vmem:[#allocation5 + $0xe68] sm:$0xff]  ;;  %v562_v4 = vld [vmem:[#allocation5 + $0xee0] sm:$0xff] }
 0x103   :  { %2306 = vmatprep.subr.mxu1 %v528_v5  ;;  %2272 = vmatpush3.msra.mxu0 %v480_v6  ;;  %v579_v3 = vld [vmem:[#allocation5 + $0xf68] sm:$0xff]  ;;  %v594_v5 = vld [vmem:[#allocation5 + $0xfe0] sm:$0xff] }
 0x104   :  { %2307 = vmatpush3.msra.mxu1 %v512_v7  ;;  %2273 = vmatprep.subr.mxu0 %v495_v8  ;;  %v546_v6 = vld [vmem:[#allocation5 + $0xe60] sm:$0xff]  ;;  %v561_v8 = vld [vmem:[#allocation5 + $0xed8] sm:$0xff] }
 0x105   :  { %2308 = vmatprep.subr.mxu1 %v527_v9  ;;  %2274 = vmatpush3.msra.mxu0 %v479_v10  ;;  %v578_v7 = vld [vmem:[#allocation5 + $0xf60] sm:$0xff]  ;;  %v593_v9 = vld [vmem:[#allocation5 + $0xfd8] sm:$0xff] }
 0x106   :  { %2309 = vmatpush3.msra.mxu1 %v511_v11  ;;  %2275 = vmatprep.subr.mxu0 %v494_v12  ;;  %v545_v10 = vld [vmem:[#allocation5 + $0xe58] sm:$0xff]  ;;  %v560_v12 = vld [vmem:[#allocation5 + $0xed0] sm:$0xff] }
 0x107   :  { %2310 = vmatprep.subr.mxu1 %v526_v13  ;;  %2276 = vmatpush3.msra.mxu0 %v478_v14  ;;  %v577_v11 = vld [vmem:[#allocation5 + $0xf58] sm:$0xff]  ;;  %v592_v13 = vld [vmem:[#allocation5 + $0xfd0] sm:$0xff] }
 0x108   :  { %2311 = vmatpush3.msra.mxu1 %v510_v15  ;;  %2277 = vmatprep.subr.mxu0 %v493_v16  ;;  %v544_v14 = vld [vmem:[#allocation5 + $0xe50] sm:$0xff]  ;;  %v559_v16 = vld [vmem:[#allocation5 + $0xec8] sm:$0xff] }
 0x109   :  { %2312 = vmatprep.subr.mxu1 %v525_v17  ;;  %2278 = vmatpush3.msra.mxu0 %v477_v18  ;;  %v576_v15 = vld [vmem:[#allocation5 + $0xf50] sm:$0xff]  ;;  %v591_v17 = vld [vmem:[#allocation5 + $0xfc8] sm:$0xff] }
 0x10a   :  { %2313 = vmatpush3.msra.mxu1 %v509_v19  ;;  %2279 = vmatprep.subr.mxu0 %v492_v20  ;;  %v543_v18 = vld [vmem:[#allocation5 + $0xe48] sm:$0xff]  ;;  %v558_v20 = vld [vmem:[#allocation5 + $0xec0] sm:$0xff] }
 0x10b   :  { %2314 = vmatprep.subr.mxu1 %v524_v21  ;;  %2280 = vmatpush3.msra.mxu0 %v476_v22  ;;  %v575_v19 = vld [vmem:[#allocation5 + $0xf48] sm:$0xff]  ;;  %v590_v21 = vld [vmem:[#allocation5 + $0xfc0] sm:$0xff] }
 0x10c   :  { %2315 = vmatpush3.msra.mxu1 %v508_v23  ;;  %2281 = vmatprep.subr.mxu0 %v491_v24  ;;  %v542_v22 = vld [vmem:[#allocation5 + $0xe40] sm:$0xff]  ;;  %v557_v24 = vld [vmem:[#allocation5 + $0xeb8] sm:$0xff] }
 0x10d   :  { %2316 = vmatprep.subr.mxu1 %v523_v25  ;;  %2282 = vmatpush3.msra.mxu0 %v475_v26  ;;  %v574_v23 = vld [vmem:[#allocation5 + $0xf40] sm:$0xff]  ;;  %v589_v25 = vld [vmem:[#allocation5 + $0xfb8] sm:$0xff] }
 0x10e   :  { %2317 = vmatpush3.msra.mxu1 %v507_v27  ;;  %2283 = vmatprep.subr.mxu0 %v490_v28  ;;  %v541_v26 = vld [vmem:[#allocation5 + $0xe38] sm:$0xff]  ;;  %v556_v28 = vld [vmem:[#allocation5 + $0xeb0] sm:$0xff] }
 0x10f   :  { %2318 = vmatprep.subr.mxu1 %v522_v29  ;;  %2284 = vmatpush3.msra.mxu0 %v474_v30  ;;  %v573_v27 = vld [vmem:[#allocation5 + $0xf38] sm:$0xff]  ;;  %v588_v29 = vld [vmem:[#allocation5 + $0xfb0] sm:$0xff] }
 0x110   :  { %2319 = vmatpush3.msra.mxu1 %v506_v31  ;;  %2285 = vmatprep.subr.mxu0 %v489_v32  ;;  %v540_v30 = vld [vmem:[#allocation5 + $0xe30] sm:$0xff]  ;;  %v555_v32 = vld [vmem:[#allocation5 + $0xea8] sm:$0xff] }
 0x111   :  { %2320 = vmatprep.subr.mxu1 %v521_v33  ;;  %2286 = vmatpush3.msra.mxu0 %v473_v34  ;;  %v572_v31 = vld [vmem:[#allocation5 + $0xf30] sm:$0xff]  ;;  %v587_v33 = vld [vmem:[#allocation5 + $0xfa8] sm:$0xff] }
 0x112   :  { %2321 = vmatpush3.msra.mxu1 %v505_v35  ;;  %2287 = vmatprep.subr.mxu0 %v488_v36  ;;  %v539_v34 = vld [vmem:[#allocation5 + $0xe28] sm:$0xff]  ;;  %v554_v36 = vld [vmem:[#allocation5 + $0xea0] sm:$0xff] }
 0x113   :  { %2322 = vmatprep.subr.mxu1 %v520_v37  ;;  %2288 = vmatpush3.msra.mxu0 %v472_v38  ;;  %v571_v35 = vld [vmem:[#allocation5 + $0xf28] sm:$0xff]  ;;  %v586_v37 = vld [vmem:[#allocation5 + $0xfa0] sm:$0xff] }
 0x114   :  { %2323 = vmatpush3.msra.mxu1 %v504_v39  ;;  %2289 = vmatprep.subr.mxu0 %v487_v42  ;;  %v538_v38 = vld [vmem:[#allocation5 + $0xe20] sm:$0xff]  ;;  %v537_v42 = vld [vmem:[#allocation5 + $0xe18] sm:$0xff] }
 0x115   :  { %2324 = vmatprep.subr.mxu1 %v519_v43  ;;  %2290 = vmatpush3.msra.mxu0 %v471_v44  ;;  %v570_v39 = vld [vmem:[#allocation5 + $0xf20] sm:$0xff]  ;;  %v569_v43 = vld [vmem:[#allocation5 + $0xf18] sm:$0xff]  ;;  %v552_v44 = vld [vmem:[#allocation5 + $0xe90] sm:$0xff] }
 0x116   :  { %2325 = vmatpush3.msra.mxu1 %v503_v45  ;;  %2291 = vmatprep.subr.mxu0 %v486_v48  ;;  %v584_v45 = vld [vmem:[#allocation5 + $0xf90] sm:$0xff]  ;;  %v551_v48 = vld [vmem:[#allocation5 + $0xe88] sm:$0xff] }
 0x117   :  { %2326 = vmatprep.subr.mxu1 %v518_v49  ;;  %2292 = vmatpush3.msra.mxu0 %v470_v51  ;;  %v68_v49 = vld [vmem:[#allocation2 + $0x70] sm:$0xff]  ;;  %v583_v51 = vld [vmem:[#allocation5 + $0xf88] sm:$0xff] }
 0x118   :  { %1605 = vmatprep.mubr.f32.mxu0 %v662_v50  ;;  %2327 = vmatpush3.msra.mxu1 %v502_v53  ;;  %v84_v50 = vld [vmem:[#allocation2 + $0xf0] sm:$0xff]  ;;  %v85_v53 = vld [vmem:[#allocation2 + $0xf8] sm:$0xff] }
 0x119   :  { %1606 = vmatmul.mubr.f32.vlgmr.msra.gmra.mxu0 %v661_v52  ;;  %1675 = vmatprep.mubr.f32.mxu1 %v664_v54  ;;  %v69_v52 = vld [vmem:[#allocation2 + $0x78] sm:$0xff]  ;;  %v535_v54 = vld [vmem:[#allocation5 + $0xe08] sm:$0xff] }
 0x11a   :  { %2331 = vmatprep.subr.mxu0 %v565_v56  ;;  %2366 = vmatprep.subr.mxu1 %v597_v57  ;;  %v550_v56 = vld [vmem:[#allocation5 + $0xe80] sm:$0xff] }
 0x11b   :  { %1676 = vmatmul.mubr.f32.vlgmr.msra.gmra.mxu1 %v663_v55  ;;  %2332 = vmatpush3.msra.mxu0 %v549_v58  ;;  %v567_v55 = vld [vmem:[#allocation5 + $0xf08] sm:$0xff]  ;;  %v582_v57 = vld [vmem:[#allocation5 + $0xf80] sm:$0xff]  ;;  %v666_v58 = vcombine.high %v68_v49, %v84_v50 }
 0x11c   :  { %2367 = vmatpush3.msra.mxu1 %v581_v59  ;;  %2333 = vmatprep.subr.mxu0 %v564_v60  ;;  %v534_v59 = vld [vmem:[#allocation5 + $0xe00] sm:$0xff]  ;;  %v668_v60 = vcombine.high %v69_v52, %v85_v53 }
 0x11d   :  { %2368 = vmatprep.subr.mxu1 %v596_v61  ;;  %2334 = vmatpush3.msra.mxu0 %v548_v62  ;;  %v665_v61 = vcombine.low %v68_v49, %v84_v50  ;;  %v566_v62 = vld [vmem:[#allocation5 + $0xf00] sm:$0xff] }
 0x11e   :  { %2369 = vmatpush3.msra.mxu1 %v580_v63  ;;  %2335 = vmatprep.subr.mxu0 %v563_v0  ;;  %v667_v63 = vcombine.low %v69_v52, %v85_v53  ;;  %v1873_v0 = vpop.f32.mrf.mxu0 }
 0x11f   :  { %2370 = vmatprep.subr.mxu1 %v595_v1  ;;  %2336 = vmatpush3.msra.mxu0 %v547_v2  ;;  %v1908_v1 = vpop.f32.mrf.mxu1 }
 0x120   :  { %2371 = vmatpush3.msra.mxu1 %v579_v3  ;;  %2337 = vmatprep.subr.mxu0 %v562_v4  ;;  %v1874_v2 = vpop.f32.mrf.mxu0 }
 0x121   :  { %2372 = vmatprep.subr.mxu1 %v594_v5  ;;  %2338 = vmatpush3.msra.mxu0 %v546_v6  ;;  %v1875_v4 = vadd.f32 %v1874_v2, %v1873_v0  ;;  %v1840_v5 = vld [vmem:[#allocation7] ss:$0 sm:$0xff]  ;;  %v1909_v6 = vpop.f32.mrf.mxu1 }
 0x122   :  { %2373 = vmatpush3.msra.mxu1 %v578_v7  ;;  %2339 = vmatprep.subr.mxu0 %v561_v8 }
 0x123   :  { %2374 = vmatprep.subr.mxu1 %v593_v9  ;;  %2340 = vmatpush3.msra.mxu0 %v545_v10  ;;  %v768_v9 = vadd.f32 %v1875_v4, %v1840_v5  ;;  %v1910_v10 = vadd.f32 %v1909_v6, %v1908_v1 }
 0x124   :  { %2375 = vmatpush3.msra.mxu1 %v577_v11  ;;  %2341 = vmatprep.subr.mxu0 %v560_v12 }
 0x125   :  { %2376 = vmatprep.subr.mxu1 %v592_v13  ;;  %2342 = vmatpush3.msra.mxu0 %v544_v14  ;;  %v838_v14 = vadd.f32 %v1910_v10, %v768_v9 }
 0x126   :  { %2377 = vmatpush3.msra.mxu1 %v576_v15  ;;  %2343 = vmatprep.subr.mxu0 %v559_v16 }
 0x127   :  { %2378 = vmatprep.subr.mxu1 %v591_v17  ;;  %2344 = vmatpush3.msra.mxu0 %v543_v18 }
 0x128   :  { %2379 = vmatpush3.msra.mxu1 %v575_v19  ;;  %2345 = vmatprep.subr.mxu0 %v558_v20 }
 0x129   :  { %2380 = vmatprep.subr.mxu1 %v590_v21  ;;  %2346 = vmatpush3.msra.mxu0 %v542_v22 }
 0x12a   :  { %2381 = vmatpush3.msra.mxu1 %v574_v23  ;;  %2347 = vmatprep.subr.mxu0 %v557_v24 }
 0x12b   :  { %2382 = vmatprep.subr.mxu1 %v589_v25  ;;  %2348 = vmatpush3.msra.mxu0 %v541_v26 }
 0x12c   :  { %2383 = vmatpush3.msra.mxu1 %v573_v27  ;;  %2349 = vmatprep.subr.mxu0 %v556_v28 }
 0x12d   :  { %2384 = vmatprep.subr.mxu1 %v588_v29  ;;  %2350 = vmatpush3.msra.mxu0 %v540_v30 }
 0x12e   :  { %2385 = vmatpush3.msra.mxu1 %v572_v31  ;;  %2351 = vmatprep.subr.mxu0 %v555_v32 }
 0x12f   :  { %2386 = vmatprep.subr.mxu1 %v587_v33  ;;  %2352 = vmatpush3.msra.mxu0 %v539_v34  ;;  %v1943_v3 = vpop.f32.mrf.mxu0 }
 0x130   :  { %2387 = vmatpush3.msra.mxu1 %v571_v35  ;;  %2353 = vmatprep.subr.mxu0 %v554_v36 }
 0x131   :  { %2388 = vmatprep.subr.mxu1 %v586_v37  ;;  %2354 = vmatpush3.msra.mxu0 %v538_v38  ;;  %v1978_v7 = vpop.f32.mrf.mxu1  ;;  %v1944_v8 = vpop.f32.mrf.mxu0 }
 0x132   :  { %2389 = vmatpush3.msra.mxu1 %v570_v39  ;;  %2355 = vmatprep.subr.mxu0 %v553_v40  ;;  %v1945_v12 = vadd.f32 %v1944_v8, %v1943_v3 }
 0x133   :  { %2390 = vmatprep.subr.mxu1 %v585_v41  ;;  %2356 = vmatpush3.msra.mxu0 %v537_v42  ;;  %v1979_v13 = vpop.f32.mrf.mxu1 }
 0x134   :  { %2391 = vmatpush3.msra.mxu1 %v569_v43  ;;  %2357 = vmatprep.subr.mxu0 %v552_v44  ;;  %v908_v17 = vadd.f32 %v1945_v12, %v838_v14  ;;  %v1980_v18 = vadd.f32 %v1979_v13, %v1978_v7 }
 0x135   :  { %2392 = vmatprep.subr.mxu1 %v584_v45  ;;  %2358 = vmatpush3.msra.mxu0 %v536_v46 }
 0x136   :  { %2393 = vmatpush3.msra.mxu1 %v568_v47  ;;  %2359 = vmatprep.subr.mxu0 %v551_v48  ;;  %v978_v22 = vadd.f32 %v1980_v18, %v908_v17 }
 0x137   :  { %2394 = vmatprep.subr.mxu1 %v583_v51  ;;  %2360 = vmatpush3.msra.mxu0 %v535_v54 }
 0x138   :  { %2395 = vmatpush3.msra.mxu1 %v567_v55  ;;  %2361 = vmatprep.subr.mxu0 %v550_v56 }
 0x139   :  { %2396 = vmatprep.subr.mxu1 %v582_v57  ;;  %2362 = vmatpush3.msra.mxu0 %v534_v59 }
 0x13a   :  { %1745 = vmatprep.mubr.f32.mxu0 %v666_v58  ;;  %2397 = vmatpush3.msra.mxu1 %v566_v62 }
 0x13b   :  { %1815 = vmatprep.mubr.f32.mxu1 %v668_v60  ;;  %1746 = vmatmul.mubr.f32.vlgmr.msra.gmra.mxu0 %v665_v61 }
 0x13c   :  { %1816 = vmatmul.mubr.f32.vlgmr.msra.gmra.mxu1 %v667_v63 }
 0x151   :  { %v2013_v11 = vpop.f32.mrf.mxu0 }
 0x153   :  { %v2048_v15 = vpop.f32.mrf.mxu1  ;;  %v2014_v16 = vpop.f32.mrf.mxu0 }
 0x154   :  { %v2015_v20 = vadd.f32 %v2014_v16, %v2013_v11 }
 0x155   :  { %v2049_v21 = vpop.f32.mrf.mxu1 }
 0x156   :  { %v1048_v25 = vadd.f32 %v2015_v20, %v978_v22  ;;  %v2050_v26 = vadd.f32 %v2049_v21, %v2048_v15 }
 0x158   :  { %v1118_v30 = vadd.f32 %v2050_v26, %v1048_v25 }
 0x173   :  { %v2083_v19 = vpop.f32.mrf.mxu0 }
 0x175   :  { %v2118_v23 = vpop.f32.mrf.mxu1  ;;  %v2084_v24 = vpop.f32.mrf.mxu0 }
 0x176   :  { %v2085_v28 = vadd.f32 %v2084_v24, %v2083_v19 }
 0x177   :  { %v2119_v29 = vpop.f32.mrf.mxu1 }
 0x178   :  { %v1188_v33 = vadd.f32 %v2085_v28, %v1118_v30  ;;  %v2120_v34 = vadd.f32 %v2119_v29, %v2118_v23 }
 0x17a   :  { %v1258_v38 = vadd.f32 %v2120_v34, %v1188_v33 }
 0x195   :  { %v2153_v27 = vpop.f32.mrf.mxu0 }
 0x197   :  { %v2188_v31 = vpop.f32.mrf.mxu1  ;;  %v2154_v32 = vpop.f32.mrf.mxu0 }
 0x198   :  { %v2155_v36 = vadd.f32 %v2154_v32, %v2153_v27 }
 0x199   :  { %v2189_v37 = vpop.f32.mrf.mxu1 }
 0x19a   :  { %v1328_v41 = vadd.f32 %v2155_v36, %v1258_v38  ;;  %v2190_v42 = vadd.f32 %v2189_v37, %v2188_v31 }
 0x19c   :  { %v1398_v46 = vadd.f32 %v2190_v42, %v1328_v41 }
 0x1b7   :  { %v2223_v35 = vpop.f32.mrf.mxu0 }
 0x1b9   :  { %v2258_v39 = vpop.f32.mrf.mxu1  ;;  %v2224_v40 = vpop.f32.mrf.mxu0 }
 0x1ba   :  { %v2225_v44 = vadd.f32 %v2224_v40, %v2223_v35 }
 0x1bb   :  { %v2259_v45 = vpop.f32.mrf.mxu1 }
 0x1bc   :  { %v1468_v49 = vadd.f32 %v2225_v44, %v1398_v46  ;;  %v2260_v50 = vadd.f32 %v2259_v45, %v2258_v39 }
 0x1be   :  { %v1538_v53 = vadd.f32 %v2260_v50, %v1468_v49 }
 0x1d9   :  { %v2293_v43 = vpop.f32.mrf.mxu0 }
 0x1db   :  { %v2328_v47 = vpop.f32.mrf.mxu1  ;;  %v2294_v48 = vpop.f32.mrf.mxu0 }
 0x1dc   :  { %v2295_v51 = vadd.f32 %v2294_v48, %v2293_v43 }
 0x1dd   :  { %v2329_v52 = vpop.f32.mrf.mxu1 }
 0x1de   :  { %v1608_v54 = vadd.f32 %v2295_v51, %v1538_v53  ;;  %v2330_v55 = vadd.f32 %v2329_v52, %v2328_v47 }
 0x1e0   :  { %v1678_v60 = vadd.f32 %v2330_v55, %v1608_v54 }
 0x1fb   :  { %v2363_v56 = vpop.f32.mrf.mxu0 }
 0x1fc   :  { %v2398_v57 = vpop.f32.mrf.mxu1 }
 0x1fd   :  { %v2364_v58 = vpop.f32.mrf.mxu0 }
 0x1fe   :  { %v2399_v59 = vpop.f32.mrf.mxu1  ;;  %v2365_v61 = vadd.f32 %v2364_v58, %v2363_v56 }
 0x1ff   :  { %v2400_v63 = vadd.f32 %v2399_v59, %v2398_v57 }
 0x200   :  { %v1748_v62 = vadd.f32 %v2365_v61, %v1678_v60 }
 0x202   :  { %v1818_v0 = vadd.f32 %v2400_v63, %v1748_v62 }
 0x204   :  { %1821 = vst [vmem:[#allocation8] sm:$0xff] %v1818_v0 }
 0x205   :  { %1826 = vsyncadd [#allocation4], 64  ;;  %s2502_s0 = smov [#allocation8]  }
 0x206   :  { %s1827_s2 = sshll.u32 %s2502_s0, 4  ;;  %s1828_s2 = int_to_ptr.vmem [resolvable:$true] %s1827_s2 }
 0x207   :  { %s2470_s4 = scalar_lea.vmem %s1828_s2, 64  ;;  %s2474_s5 = scalar_lea.vmem %s1828_s2, 128 }
 0x208   :  { %p2471_p1 = scmp.ne.s32.totalorder %s1828_s2, %s2470_s4  ;;  %p2475_p2 = scmp.lt.s32.totalorder %s1828_s2, %s1828_s2 }
 0x209   :  { %p2476_p3 = scmp.lt.s32.totalorder %s2474_s5, %s2470_s4 }
 0x20b   :  { %p2477_p4 = por %p2476_p3, %p2475_p2 }
 0x20d   :  { %p2478_p5 = pnand %p2477_p4, %p2471_p1 }
 0x20f   :  { %2481 = shalt.err (!%p2478_p5)
}
 0x210   :  { %s2503_s6 = smov 64   ;;  %s2504_s7 = smov 4  }
 0x211   :  { %1833 = dma.vmem_to_hbm [thread:$0]  %s1828_s2, 64, %s2540_s3, [#allocation4], %s2503_s6, %s2503_s6, %s2504_s7  }
 0x212   :  { %2494 = dma.done.wait [#allocation4], 128  }
 0x213   :  { %2495 = vsyncadd [#allocation4], 4294967168 }
 0x214   :  { %1837 = vsyncpa [#allocation3], 1 }
 0x215   :  { %1838 = vsyncpa [#allocation6], 1 }
 0x216   :  { %1839 = vsyncpa [#allocation4], 1 }

</bundles_post_ra>
